<compile_context>
chip_gen: v7x
topology: tpu7x:2x2x1
jax: 0.10.0
libtpu: 0.0.40
codegen_flags: <defaults>
</compile_context>

<pallas_src>
import functools
import math

import jax
import jax.numpy as jnp
from jax.experimental import pallas as pl
from jax.experimental.pallas import tpu as pltpu

# ---- module hyper-parameters (from __init__) -------------------------------
MAX_SIGMA = 10.0
MIN_SIGMA = 0.0001
WHEELBASE = 2.96
MAX_STEER = math.radians(80.0)
DT = 0.1
C_R = 0.01
C_A = 0.05
# TODO(synk): self.obs_scale is never defined in the reference __init__; use 1.0.
OBS_SCALE = 1.0

_HALF_PI = 0.5 * math.pi
_TWO_PI = 2.0 * math.pi
_INV_TWO_PI = 1.0 / (2.0 * math.pi)


def _sigmoid(z):
    # tanh form: one EUP op instead of exp + full-precision divide.
    return 0.5 * jnp.tanh(0.5 * z) + 0.5


def traj_pred_kernel(x_ref, w1_ref, b1_ref, w2_ref, b2_ref, w3_ref, b3_ref,
                     wh_ref, bh_ref, out_ref, *, c_out, out_rows):
    # x arrives batch-major (TILE_N, C_in); one XLU transpose makes every later
    # op lane-dense (batch on the 128-wide lane axis).
    x_t = x_ref[...].T                                    # (C_in, TILE_N), f32
    tile_n = x_t.shape[-1]

    # ---- MLP: Linear+Sigmoid x3, fused mu/sigma head (MXU, f32 accum) ------
    # normalize_state_function scale is pre-folded into W1 in the wrapper.
    h = _sigmoid(jnp.dot(w1_ref[...], x_t.astype(w1_ref.dtype),
                         preferred_element_type=jnp.float32) + b1_ref[...])
    h = _sigmoid(jnp.dot(w2_ref[...], h.astype(w2_ref.dtype),
                         preferred_element_type=jnp.float32) + b2_ref[...])
    h = _sigmoid(jnp.dot(w3_ref[...], h.astype(w3_ref.dtype),
                         preferred_element_type=jnp.float32) + b3_ref[...])
    head = jnp.dot(wh_ref[...], h.astype(wh_ref.dtype),
                   preferred_element_type=jnp.float32) + bh_ref[...]  # (2*c_out, T)

    sigma = MIN_SIGMA + (MAX_SIGMA - MIN_SIGMA) * _sigmoid(head[c_out:, :])

    # ---- kinematic bicycle model on the *raw* observations, action = mu ----
    # TODO(synk): reference indexing (obs[i][k] vs pred_action[0][i][k]) is
    # inconsistent; implemented the intended row-wise semantics.
    pos = x_t[0:2, :]                                     # (2, T): [px; py]
    vx = x_t[2:3, :]
    vy = x_t[3:4, :]
    yaw = x_t[4:5, :]
    if OBS_SCALE != 1.0:                                  # trace-time guard
        pos = pos * OBS_SCALE
        vx = vx * OBS_SCALE
        vy = vy * OBS_SCALE
        yaw = yaw * OBS_SCALE
    v = jnp.sqrt(vx * vx + vy * vy)

    throttle = head[0:1, :]
    delta = jnp.clip(head[1:2, :], -MAX_STEER, MAX_STEER)

    # One EUP pass over a 4-sublane stack instead of four 1-sublane trig calls:
    # rows = [cos(yaw); sin(yaw); cos(delta); sin(delta)]   (sin(a+pi/2)=cos(a))
    ang = jnp.concatenate([yaw + _HALF_PI, yaw, delta + _HALF_PI, delta], axis=0)
    trig = jnp.sin(ang)                                   # (4, T)
    cs_yaw = trig[0:2, :]                                 # [cos(yaw); sin(yaw)]
    cos_d = trig[2:3, :]
    sin_d = trig[3:4, :]

    f_load = v * (C_R + C_A * v)
    v_new = v + DT * (throttle - f_load)
    pos_n = pos + (DT * v_new) * cs_yaw                   # (2, T): [px_n; py_n]
    # tan(delta) = sin * approx-reciprocal(cos): rides the EUP, no f32 divide.
    yaw_n = yaw + (DT / WHEELBASE) * v_new * sin_d * pl.reciprocal(cos_d, approx=True)
    # normalise_angle(yaw) == atan2(sin, cos): wrap to [-pi, pi) via mul, no divide.
    yaw_n = yaw_n - _TWO_PI * jnp.floor((yaw_n + jnp.pi) * _INV_TWO_PI)
    # [cos(yaw_n); sin(yaw_n)] in a single 2-sublane EUP pass.
    cs_yaw_n = jnp.sin(jnp.concatenate([yaw_n + _HALF_PI, yaw_n], axis=0))

    # ---- fused lane-dense output slab: rows 0-4 pred, 5:5+c_out sigma -------
    if OBS_SCALE != 1.0:
        inv = 1.0 / OBS_SCALE
        out_ref[0:2, :] = pos_n * inv
        out_ref[2:4, :] = (v_new * inv) * cs_yaw_n        # [v*cos; v*sin]
        out_ref[4:5, :] = yaw_n * inv
    else:
        out_ref[0:2, :] = pos_n
        out_ref[2:4, :] = v_new * cs_yaw_n                # [v*cos; v*sin]
        out_ref[4:5, :] = yaw_n
    out_ref[5:5 + c_out, :] = sigma
    if out_rows > 5 + c_out:                              # static pad rows -> zero
        out_ref[5 + c_out:, :] = jnp.zeros((out_rows - 5 - c_out, tile_n),
                                           jnp.float32)


def _choose_tile_n(n, tile_n):
    """Multiple-of-128 lane tile; keep >=2 grid steps so v7x's two TCs get work."""
    tile_n = max(128, (tile_n // 128) * 128)
    while tile_n > 128 and (n + tile_n - 1) // tile_n < 2:
        tile_n //= 2
    return tile_n


def traj_pred_gaussian_integrate(x, nscale, params, *, tile_n=512,
                                 mlp_dtype=jnp.float32):
    """Returns (pred_state (N,5), sigma (N,c_out)).

    mlp_dtype=jnp.bfloat16 is recommended on v6e/v7x (native bf16 MXU/VPU/EUP);
    keep float32 on v5e (no bf16 VPU/EUP) or when tight tolerances matter.
    """
    n, c_in = x.shape
    hidden = params["w1"].shape[1]
    c_out = params["wmu"].shape[1]

    tile_n = _choose_tile_n(n, tile_n)
    n_pad = ((n + tile_n - 1) // tile_n) * tile_n
    out_rows = ((5 + c_out + 7) // 8) * 8                 # sublane-aligned slab

    # batch-major x (no wrapper transpose pass); zero-pad the ragged tail rows.
    x_pad = jnp.zeros((n_pad, c_in), jnp.float32).at[:n, :].set(x.astype(jnp.float32))

    # fold normalize_state_function (x * nscale) into W1: (x*s) @ W == x @ (diag(s) W)
    w1_t = (nscale.reshape(c_in, 1) * params["w1"]).T.astype(mlp_dtype)  # (hidden, c_in)
    w2_t = params["w2"].T.astype(mlp_dtype)                              # (hidden, hidden)
    w3_t = params["w3"].T.astype(mlp_dtype)
    b1_t = params["b1"].reshape(hidden, 1).astype(jnp.float32)
    b2_t = params["b2"].reshape(hidden, 1).astype(jnp.float32)
    b3_t = params["b3"].reshape(hidden, 1).astype(jnp.float32)
    # fused heads: rows [0:c_out] = mu, rows [c_out:] = sigma logits
    wh = jnp.concatenate([params["wmu"], params["wsig"]], axis=1).T.astype(mlp_dtype)
    bh = jnp.concatenate([params["bmu"], params["bsig"]],
                         axis=1).reshape(2 * c_out, 1).astype(jnp.float32)

    resident = lambda i: (0, 0)
    grid = (n_pad // tile_n,)

    out = pl.pallas_call(
        functools.partial(traj_pred_kernel, c_out=c_out, out_rows=out_rows),
        out_shape=jax.ShapeDtypeStruct((out_rows, n_pad), jnp.float32),
        grid_spec=pltpu.PrefetchScalarGridSpec(
            num_scalar_prefetch=0,
            grid=grid,
            in_specs=[
                pl.BlockSpec((tile_n, c_in), lambda i: (i, 0)),   # x tile (batch-major)
                pl.BlockSpec((hidden, c_in), resident),           # W1 (nscale folded)
                pl.BlockSpec((hidden, 1), resident),              # b1
                pl.BlockSpec((hidden, hidden), resident),         # W2
                pl.BlockSpec((hidden, 1), resident),              # b2
                pl.BlockSpec((hidden, hidden), resident),         # W3
                pl.BlockSpec((hidden, 1), resident),              # b3
                pl.BlockSpec((2 * c_out, hidden), resident),      # fused head W
                pl.BlockSpec((2 * c_out, 1), resident),           # fused head b
            ],
            out_specs=pl.BlockSpec((out_rows, tile_n), lambda i: (0, i)),
        ),
        compiler_params=pltpu.CompilerParams(
            dimension_semantics=("parallel",)),
    )(x_pad, w1_t, b1_t, w2_t, b2_t, w3_t, b3_t, wh, bh)

    # drop padded columns/rows; hand back (N, 5) / (N, c_out)
    pred_state = out[:5, :n].T
    sigma = out[5:5 + c_out, :n].T
    return pred_state, sigma


# ---- deterministic parameter init (PyTorch Linear-style uniform) ------------
def linear_params(key, fan_in, fan_out):
    kw, kb = jax.random.split(key)
    bound = 1.0 / math.sqrt(fan_in)
    w = jax.random.uniform(kw, (fan_in, fan_out), jnp.float32, -bound, bound)
    b = jax.random.uniform(kb, (1, fan_out), jnp.float32, -bound, bound)
    return w, b


# ---- pure-JAX reference for correctness ------------------------------------
def reference(x, nscale, p):
    nx = x * nscale
    h = jax.nn.sigmoid(nx @ p["w1"] + p["b1"])
    h = jax.nn.sigmoid(h @ p["w2"] + p["b2"])
    h = jax.nn.sigmoid(h @ p["w3"] + p["b3"])
    mu = h @ p["wmu"] + p["bmu"]
    sigma = MIN_SIGMA + (MAX_SIGMA - MIN_SIGMA) * jax.nn.sigmoid(h @ p["wsig"] + p["bsig"])

    px, py = x[:, 0:1] * OBS_SCALE, x[:, 1:2] * OBS_SCALE
    vx, vy = x[:, 2:3] * OBS_SCALE, x[:, 3:4] * OBS_SCALE
    yaw = x[:, 4:5] * OBS_SCALE
    v = jnp.sqrt(vx * vx + vy * vy)
    throttle = mu[:, 0:1]
    delta = jnp.clip(mu[:, 1:2], -MAX_STEER, MAX_STEER)
    f_load = v * (C_R + C_A * v)
    v_new = v + DT * (throttle - f_load)
    px_n = px + v_new * jnp.cos(yaw) * DT
    py_n = py + v_new * jnp.sin(yaw) * DT
    yaw_n = yaw + v_new * jnp.tan(delta) / WHEELBASE * DT
    yaw_n = jnp.arctan2(jnp.sin(yaw_n), jnp.cos(yaw_n))
    pred = jnp.concatenate(
        [px_n / OBS_SCALE, py_n / OBS_SCALE,
         v_new * jnp.cos(yaw_n) / OBS_SCALE,
         v_new * jnp.sin(yaw_n) / OBS_SCALE,
         yaw_n / OBS_SCALE], axis=-1)
    return pred, sigma


if __name__ == "__main__":
    # 600 states of 8 features -> TILE_N=512, 2 grid steps (exercises the large
    # lane tile, the ragged-tail padding, and both v7x TensorCores).
    N, C_IN, HIDDEN, C_OUT = 600, 8, 32, 2  # C_OUT=2 -> (throttle, steering)

    key = jax.random.PRNGKey(0)
    kx, k1, k2, k3, kmu, ksig = jax.random.split(key, 6)

    x = jax.random.normal(kx, (N, C_IN), jnp.float32)
    # normalize_state_function: x -> x * 0.1 (deterministic per-feature scale)
    nscale = jnp.full((1, C_IN), 0.1, jnp.float32)

    params = {}
    params["w1"], params["b1"] = linear_params(k1, C_IN, HIDDEN)
    params["w2"], params["b2"] = linear_params(k2, HIDDEN, HIDDEN)
    params["w3"], params["b3"] = linear_params(k3, HIDDEN, HIDDEN)
    params["wmu"], params["bmu"] = linear_params(kmu, HIDDEN, C_OUT)
    params["wsig"], params["bsig"] = linear_params(ksig, HIDDEN, C_OUT)

    pred_state, sigma = jax.block_until_ready(
        traj_pred_gaussian_integrate(x, nscale, params))

    ref_pred, ref_sigma = reference(x, nscale, params)
    assert pred_state.shape == (N, 5) and sigma.shape == (N, C_OUT)
    # 2e-3: headroom for approx-reciprocal tan and sin(x+pi/2)-as-cos identities.
    assert jnp.allclose(pred_state, ref_pred, atol=2e-3, rtol=2e-3)
    assert jnp.allclose(sigma, ref_sigma, atol=1e-3, rtol=1e-3)

    print("KERNEL_OK")
</pallas_src>

<mosaic_0001>
module attributes {stable_mosaic.version = 11 : i64} {
  func.func @traj_pred_kernel(%arg0: i32, %arg1: memref<512x8xf32, #tpu.memory_space<vmem>>, %arg2: memref<32x8xf32, #tpu.memory_space<vmem>>, %arg3: memref<32x1xf32, #tpu.memory_space<vmem>>, %arg4: memref<32x32xf32, #tpu.memory_space<vmem>>, %arg5: memref<32x1xf32, #tpu.memory_space<vmem>>, %arg6: memref<32x32xf32, #tpu.memory_space<vmem>>, %arg7: memref<32x1xf32, #tpu.memory_space<vmem>>, %arg8: memref<4x32xf32, #tpu.memory_space<vmem>>, %arg9: memref<4x1xf32, #tpu.memory_space<vmem>>, %arg10: memref<8x512xf32, #tpu.memory_space<vmem>>) attributes {dimension_semantics = [#tpu.dimension_semantics<parallel>], iteration_bounds = array<i64: 2>, scalar_prefetch = 0 : i64, scratch_operands = 0 : i64, tpu.core_type = #tpu.core_type<tc>, window_params = [{transform_indices = @transform_0, window_bounds = array<i64: 512, 8>}, {pipeline_mode = #tpu.pipeline_mode<synchronous>, transform_indices = @transform_1, window_bounds = array<i64: 32, 8>}, {pipeline_mode = #tpu.pipeline_mode<synchronous>, transform_indices = @transform_2, window_bounds = array<i64: 32, 1>}, {pipeline_mode = #tpu.pipeline_mode<synchronous>, transform_indices = @transform_3, window_bounds = array<i64: 32, 32>}, {pipeline_mode = #tpu.pipeline_mode<synchronous>, transform_indices = @transform_4, window_bounds = array<i64: 32, 1>}, {pipeline_mode = #tpu.pipeline_mode<synchronous>, transform_indices = @transform_5, window_bounds = array<i64: 32, 32>}, {pipeline_mode = #tpu.pipeline_mode<synchronous>, transform_indices = @transform_6, window_bounds = array<i64: 32, 1>}, {pipeline_mode = #tpu.pipeline_mode<synchronous>, transform_indices = @transform_7, window_bounds = array<i64: 4, 32>}, {pipeline_mode = #tpu.pipeline_mode<synchronous>, transform_indices = @transform_8, window_bounds = array<i64: 4, 1>}, {transform_indices = @transform_9, window_bounds = array<i64: 8, 512>}]} {
    %c0 = arith.constant 0 : index
    %c0_0 = arith.constant 0 : index
    %0 = vector.load %arg1[%c0, %c0_0] : memref<512x8xf32, #tpu.memory_space<vmem>>, vector<512x8xf32>
    %1 = tpu.transpose %0, [1, 0] : vector<512x8xf32> -> vector<8x512xf32>
    %c0_1 = arith.constant 0 : index
    %c0_2 = arith.constant 0 : index
    %2 = vector.load %arg2[%c0_1, %c0_2] : memref<32x8xf32, #tpu.memory_space<vmem>>, vector<32x8xf32>
    %cst = arith.constant dense<0.000000e+00> : vector<32x512xf32>
    %3 = tpu.matmul %2, %1, %cst {dimension_numbers = #tpu.dot_dimension_numbers<[1], [0], [0], [1], [0, 0, 1, 1], [], []>} : vector<32x8xf32>, vector<8x512xf32>, vector<32x512xf32> -> vector<32x512xf32>
    %c0_3 = arith.constant 0 : index
    %c0_4 = arith.constant 0 : index
    %4 = vector.load %arg3[%c0_3, %c0_4] : memref<32x1xf32, #tpu.memory_space<vmem>>, vector<32x1xf32>
    %5 = vector.broadcast %4 : vector<32x1xf32> to vector<32x512xf32>
    %6 = arith.addf %3, %5 : vector<32x512xf32>
    %cst_5 = arith.constant 5.000000e-01 : f32
    %7 = vector.broadcast %cst_5 : f32 to vector<32x512xf32>
    %8 = arith.mulf %7, %6 : vector<32x512xf32>
    %9 = math.tanh %8 : vector<32x512xf32>
    %cst_6 = arith.constant 5.000000e-01 : f32
    %10 = vector.broadcast %cst_6 : f32 to vector<32x512xf32>
    %11 = arith.mulf %10, %9 : vector<32x512xf32>
    %cst_7 = arith.constant 5.000000e-01 : f32
    %12 = vector.broadcast %cst_7 : f32 to vector<32x512xf32>
    %13 = arith.addf %11, %12 : vector<32x512xf32>
    %c0_8 = arith.constant 0 : index
    %c0_9 = arith.constant 0 : index
    %14 = vector.load %arg4[%c0_8, %c0_9] : memref<32x32xf32, #tpu.memory_space<vmem>>, vector<32x32xf32>
    %cst_10 = arith.constant dense<0.000000e+00> : vector<32x512xf32>
    %15 = tpu.matmul %14, %13, %cst_10 {dimension_numbers = #tpu.dot_dimension_numbers<[1], [0], [0], [1], [0, 0, 1, 1], [], []>} : vector<32x32xf32>, vector<32x512xf32>, vector<32x512xf32> -> vector<32x512xf32>
    %c0_11 = arith.constant 0 : index
    %c0_12 = arith.constant 0 : index
    %16 = vector.load %arg5[%c0_11, %c0_12] : memref<32x1xf32, #tpu.memory_space<vmem>>, vector<32x1xf32>
    %17 = vector.broadcast %16 : vector<32x1xf32> to vector<32x512xf32>
    %18 = arith.addf %15, %17 : vector<32x512xf32>
    %cst_13 = arith.constant 5.000000e-01 : f32
    %19 = vector.broadcast %cst_13 : f32 to vector<32x512xf32>
    %20 = arith.mulf %19, %18 : vector<32x512xf32>
    %21 = math.tanh %20 : vector<32x512xf32>
    %cst_14 = arith.constant 5.000000e-01 : f32
    %22 = vector.broadcast %cst_14 : f32 to vector<32x512xf32>
    %23 = arith.mulf %22, %21 : vector<32x512xf32>
    %cst_15 = arith.constant 5.000000e-01 : f32
    %24 = vector.broadcast %cst_15 : f32 to vector<32x512xf32>
    %25 = arith.addf %23, %24 : vector<32x512xf32>
    %c0_16 = arith.constant 0 : index
    %c0_17 = arith.constant 0 : index
    %26 = vector.load %arg6[%c0_16, %c0_17] : memref<32x32xf32, #tpu.memory_space<vmem>>, vector<32x32xf32>
    %cst_18 = arith.constant dense<0.000000e+00> : vector<32x512xf32>
    %27 = tpu.matmul %26, %25, %cst_18 {dimension_numbers = #tpu.dot_dimension_numbers<[1], [0], [0], [1], [0, 0, 1, 1], [], []>} : vector<32x32xf32>, vector<32x512xf32>, vector<32x512xf32> -> vector<32x512xf32>
    %c0_19 = arith.constant 0 : index
    %c0_20 = arith.constant 0 : index
    %28 = vector.load %arg7[%c0_19, %c0_20] : memref<32x1xf32, #tpu.memory_space<vmem>>, vector<32x1xf32>
    %29 = vector.broadcast %28 : vector<32x1xf32> to vector<32x512xf32>
    %30 = arith.addf %27, %29 : vector<32x512xf32>
    %cst_21 = arith.constant 5.000000e-01 : f32
    %31 = vector.broadcast %cst_21 : f32 to vector<32x512xf32>
    %32 = arith.mulf %31, %30 : vector<32x512xf32>
    %33 = math.tanh %32 : vector<32x512xf32>
    %cst_22 = arith.constant 5.000000e-01 : f32
    %34 = vector.broadcast %cst_22 : f32 to vector<32x512xf32>
    %35 = arith.mulf %34, %33 : vector<32x512xf32>
    %cst_23 = arith.constant 5.000000e-01 : f32
    %36 = vector.broadcast %cst_23 : f32 to vector<32x512xf32>
    %37 = arith.addf %35, %36 : vector<32x512xf32>
    %c0_24 = arith.constant 0 : index
    %c0_25 = arith.constant 0 : index
    %38 = vector.load %arg8[%c0_24, %c0_25] : memref<4x32xf32, #tpu.memory_space<vmem>>, vector<4x32xf32>
    %cst_26 = arith.constant dense<0.000000e+00> : vector<4x512xf32>
    %39 = tpu.matmul %38, %37, %cst_26 {dimension_numbers = #tpu.dot_dimension_numbers<[1], [0], [0], [1], [0, 0, 1, 1], [], []>} : vector<4x32xf32>, vector<32x512xf32>, vector<4x512xf32> -> vector<4x512xf32>
    %c0_27 = arith.constant 0 : index
    %c0_28 = arith.constant 0 : index
    %40 = vector.load %arg9[%c0_27, %c0_28] : memref<4x1xf32, #tpu.memory_space<vmem>>, vector<4x1xf32>
    %41 = vector.broadcast %40 : vector<4x1xf32> to vector<4x512xf32>
    %42 = arith.addf %39, %41 : vector<4x512xf32>
    %43 = vector.extract_strided_slice %42 {offsets = [2, 0], sizes = [2, 512], strides = [1, 1]} : vector<4x512xf32> to vector<2x512xf32>
    %cst_29 = arith.constant 5.000000e-01 : f32
    %44 = vector.broadcast %cst_29 : f32 to vector<2x512xf32>
    %45 = arith.mulf %44, %43 : vector<2x512xf32>
    %46 = math.tanh %45 : vector<2x512xf32>
    %cst_30 = arith.constant 5.000000e-01 : f32
    %47 = vector.broadcast %cst_30 : f32 to vector<2x512xf32>
    %48 = arith.mulf %47, %46 : vector<2x512xf32>
    %cst_31 = arith.constant 5.000000e-01 : f32
    %49 = vector.broadcast %cst_31 : f32 to vector<2x512xf32>
    %50 = arith.addf %48, %49 : vector<2x512xf32>
    %cst_32 = arith.constant 9.99989986 : f32
    %51 = vector.broadcast %cst_32 : f32 to vector<2x512xf32>
    %52 = arith.mulf %51, %50 : vector<2x512xf32>
    %cst_33 = arith.constant 9.99999974E-5 : f32
    %53 = vector.broadcast %cst_33 : f32 to vector<2x512xf32>
    %54 = arith.addf %53, %52 : vector<2x512xf32>
    %55 = vector.extract_strided_slice %1 {offsets = [0, 0], sizes = [2, 512], strides = [1, 1]} : vector<8x512xf32> to vector<2x512xf32>
    %56 = vector.extract_strided_slice %1 {offsets = [2, 0], sizes = [1, 512], strides = [1, 1]} : vector<8x512xf32> to vector<1x512xf32>
    %57 = vector.extract_strided_slice %1 {offsets = [3, 0], sizes = [1, 512], strides = [1, 1]} : vector<8x512xf32> to vector<1x512xf32>
    %58 = vector.extract_strided_slice %1 {offsets = [4, 0], sizes = [1, 512], strides = [1, 1]} : vector<8x512xf32> to vector<1x512xf32>
    %59 = arith.mulf %56, %56 : vector<1x512xf32>
    %60 = arith.mulf %57, %57 : vector<1x512xf32>
    %61 = arith.addf %59, %60 : vector<1x512xf32>
    %62 = math.sqrt %61 : vector<1x512xf32>
    %63 = vector.extract_strided_slice %42 {offsets = [0, 0], sizes = [1, 512], strides = [1, 1]} : vector<4x512xf32> to vector<1x512xf32>
    %64 = vector.extract_strided_slice %42 {offsets = [1, 0], sizes = [1, 512], strides = [1, 1]} : vector<4x512xf32> to vector<1x512xf32>
    %cst_34 = arith.constant -1.39626336 : f32
    %cst_35 = arith.constant 1.39626336 : f32
    %65 = vector.broadcast %cst_34 : f32 to vector<1x512xf32>
    %66 = arith.maximumf %65, %64 : vector<1x512xf32>
    %67 = vector.broadcast %cst_35 : f32 to vector<1x512xf32>
    %68 = arith.minimumf %67, %66 : vector<1x512xf32>
    %cst_36 = arith.constant 1.57079637 : f32
    %69 = vector.broadcast %cst_36 : f32 to vector<1x512xf32>
    %70 = arith.addf %58, %69 : vector<1x512xf32>
    %cst_37 = arith.constant 1.57079637 : f32
    %71 = vector.broadcast %cst_37 : f32 to vector<1x512xf32>
    %72 = arith.addf %68, %71 : vector<1x512xf32>
    %73 = tpu.concatenate %70, %58, %72, %68 in 0 : vector<1x512xf32>, vector<1x512xf32>, vector<1x512xf32>, vector<1x512xf32> -> vector<4x512xf32>
    %74 = math.sin %73 : vector<4x512xf32>
    %75 = vector.extract_strided_slice %74 {offsets = [0, 0], sizes = [2, 512], strides = [1, 1]} : vector<4x512xf32> to vector<2x512xf32>
    %76 = vector.extract_strided_slice %74 {offsets = [2, 0], sizes = [1, 512], strides = [1, 1]} : vector<4x512xf32> to vector<1x512xf32>
    %77 = vector.extract_strided_slice %74 {offsets = [3, 0], sizes = [1, 512], strides = [1, 1]} : vector<4x512xf32> to vector<1x512xf32>
    %cst_38 = arith.constant 5.000000e-02 : f32
    %78 = vector.broadcast %cst_38 : f32 to vector<1x512xf32>
    %79 = arith.mulf %78, %62 : vector<1x512xf32>
    %cst_39 = arith.constant 0.00999999977 : f32
    %80 = vector.broadcast %cst_39 : f32 to vector<1x512xf32>
    %81 = arith.addf %80, %79 : vector<1x512xf32>
    %82 = arith.mulf %62, %81 : vector<1x512xf32>
    %83 = arith.subf %63, %82 : vector<1x512xf32>
    %cst_40 = arith.constant 1.000000e-01 : f32
    %84 = vector.broadcast %cst_40 : f32 to vector<1x512xf32>
    %85 = arith.mulf %84, %83 : vector<1x512xf32>
    %86 = arith.addf %62, %85 : vector<1x512xf32>
    %cst_41 = arith.constant 1.000000e-01 : f32
    %87 = vector.broadcast %cst_41 : f32 to vector<1x512xf32>
    %88 = arith.mulf %87, %86 : vector<1x512xf32>
    %89 = vector.broadcast %88 : vector<1x512xf32> to vector<2x512xf32>
    %90 = arith.mulf %89, %75 : vector<2x512xf32>
    %91 = arith.addf %55, %90 : vector<2x512xf32>
    %cst_42 = arith.constant 0.0337837823 : f32
    %92 = vector.broadcast %cst_42 : f32 to vector<1x512xf32>
    %93 = arith.mulf %92, %86 : vector<1x512xf32>
    %94 = arith.mulf %93, %77 : vector<1x512xf32>
    %95 = tpu.reciprocal %76 {approx = true} : vector<1x512xf32> -> vector<1x512xf32>
    %96 = arith.mulf %94, %95 : vector<1x512xf32>
    %97 = arith.addf %58, %96 : vector<1x512xf32>
    %cst_43 = arith.constant 3.14159274 : f32
    %98 = vector.broadcast %cst_43 : f32 to vector<1x512xf32>
    %99 = arith.addf %97, %98 : vector<1x512xf32>
    %cst_44 = arith.constant 0.159154937 : f32
    %100 = vector.broadcast %cst_44 : f32 to vector<1x512xf32>
    %101 = arith.mulf %99, %100 : vector<1x512xf32>
    %102 = math.floor %101 : vector<1x512xf32>
    %cst_45 = arith.constant 6.28318548 : f32
    %103 = vector.broadcast %cst_45 : f32 to vector<1x512xf32>
    %104 = arith.mulf %103, %102 : vector<1x512xf32>
    %105 = arith.subf %97, %104 : vector<1x512xf32>
    %cst_46 = arith.constant 1.57079637 : f32
    %106 = vector.broadcast %cst_46 : f32 to vector<1x512xf32>
    %107 = arith.addf %105, %106 : vector<1x512xf32>
    %108 = tpu.concatenate %107, %105 in 0 : vector<1x512xf32>, vector<1x512xf32> -> vector<2x512xf32>
    %109 = math.sin %108 : vector<2x512xf32>
    %c0_47 = arith.constant 0 : index
    %c0_48 = arith.constant 0 : index
    %110 = vector.load %arg10[%c0_47, %c0_48] : memref<8x512xf32, #tpu.memory_space<vmem>>, vector<2x512xf32>
    tpu.vector_store %arg10[%c0_47, %c0_48], %91 {strides = array<i32>} : memref<8x512xf32, #tpu.memory_space<vmem>>, vector<2x512xf32>,
    %111 = vector.broadcast %86 : vector<1x512xf32> to vector<2x512xf32>
    %112 = arith.mulf %111, %109 : vector<2x512xf32>
    %c2 = arith.constant 2 : index
    %c0_49 = arith.constant 0 : index
    %113 = vector.load %arg10[%c2, %c0_49] : memref<8x512xf32, #tpu.memory_space<vmem>>, vector<2x512xf32>
    tpu.vector_store %arg10[%c2, %c0_49], %112 {strides = array<i32>} : memref<8x512xf32, #tpu.memory_space<vmem>>, vector<2x512xf32>,
    %c4 = arith.constant 4 : index
    %c0_50 = arith.constant 0 : index
    %114 = vector.load %arg10[%c4, %c0_50] : memref<8x512xf32, #tpu.memory_space<vmem>>, vector<1x512xf32>
    tpu.vector_store %arg10[%c4, %c0_50], %105 {strides = array<i32>} : memref<8x512xf32, #tpu.memory_space<vmem>>, vector<1x512xf32>,
    %c5 = arith.constant 5 : index
    %c0_51 = arith.constant 0 : index
    %115 = vector.load %arg10[%c5, %c0_51] : memref<8x512xf32, #tpu.memory_space<vmem>>, vector<2x512xf32>
    tpu.vector_store %arg10[%c5, %c0_51], %54 {strides = array<i32>} : memref<8x512xf32, #tpu.memory_space<vmem>>, vector<2x512xf32>,
    %cst_52 = arith.constant 0.000000e+00 : f32
    %116 = vector.broadcast %cst_52 : f32 to vector<1x512xf32>
    %c7 = arith.constant 7 : index
    %c0_53 = arith.constant 0 : index
    %117 = vector.load %arg10[%c7, %c0_53] : memref<8x512xf32, #tpu.memory_space<vmem>>, vector<1x512xf32>
    tpu.vector_store %arg10[%c7, %c0_53], %116 {strides = array<i32>} : memref<8x512xf32, #tpu.memory_space<vmem>>, vector<1x512xf32>,
    return
  }
  func.func @transform_0(%arg0: i32) -> (i32, i32) {
    %c0_i32 = arith.constant 0 : i32
    %c0_i32_0 = arith.constant 0 : i32
    return %arg0, %c0_i32 : i32, i32
  }
  func.func @transform_1(%arg0: i32) -> (i32, i32) {
    %c0_i32 = arith.constant 0 : i32
    %c0_i32_0 = arith.constant 0 : i32
    %c0_i32_1 = arith.constant 0 : i32
    return %c0_i32, %c0_i32_0 : i32, i32
  }
  func.func @transform_2(%arg0: i32) -> (i32, i32) {
    %c0_i32 = arith.constant 0 : i32
    %c0_i32_0 = arith.constant 0 : i32
    %c0_i32_1 = arith.constant 0 : i32
    return %c0_i32, %c0_i32_0 : i32, i32
  }
  func.func @transform_3(%arg0: i32) -> (i32, i32) {
    %c0_i32 = arith.constant 0 : i32
    %c0_i32_0 = arith.constant 0 : i32
    %c0_i32_1 = arith.constant 0 : i32
    return %c0_i32, %c0_i32_0 : i32, i32
  }
  func.func @transform_4(%arg0: i32) -> (i32, i32) {
    %c0_i32 = arith.constant 0 : i32
    %c0_i32_0 = arith.constant 0 : i32
    %c0_i32_1 = arith.constant 0 : i32
    return %c0_i32, %c0_i32_0 : i32, i32
  }
  func.func @transform_5(%arg0: i32) -> (i32, i32) {
    %c0_i32 = arith.constant 0 : i32
    %c0_i32_0 = arith.constant 0 : i32
    %c0_i32_1 = arith.constant 0 : i32
    return %c0_i32, %c0_i32_0 : i32, i32
  }
  func.func @transform_6(%arg0: i32) -> (i32, i32) {
    %c0_i32 = arith.constant 0 : i32
    %c0_i32_0 = arith.constant 0 : i32
    %c0_i32_1 = arith.constant 0 : i32
    return %c0_i32, %c0_i32_0 : i32, i32
  }
  func.func @transform_7(%arg0: i32) -> (i32, i32) {
    %c0_i32 = arith.constant 0 : i32
    %c0_i32_0 = arith.constant 0 : i32
    %c0_i32_1 = arith.constant 0 : i32
    return %c0_i32, %c0_i32_0 : i32, i32
  }
  func.func @transform_8(%arg0: i32) -> (i32, i32) {
    %c0_i32 = arith.constant 0 : i32
    %c0_i32_0 = arith.constant 0 : i32
    %c0_i32_1 = arith.constant 0 : i32
    return %c0_i32, %c0_i32_0 : i32, i32
  }
  func.func @transform_9(%arg0: i32) -> (i32, i32) {
    %c0_i32 = arith.constant 0 : i32
    %c0_i32_0 = arith.constant 0 : i32
    return %c0_i32, %arg0 : i32, i32
  }
}

</mosaic_0001>

<bundles_post_ra>
// kernel: tpu_custom_call.1
= control target key start
LH: loop header
LB: loop body
LE: loop exit
PB: predicated region body
PF: predicated region fallthrough
CT: control target
= control target key end

     0   :  { %14 = vsyncpa [#allocation3], 0  ;;  %s4434_s0 = inlined_call_operand.vmem [shape: f32[1024,8], index: 0, kind: input, shape index: {}]   ;;  %s4435_s1 = inlined_call_operand.vmem [shape: f32[32,8], index: 1, kind: input, shape index: {}]   ;;  %s4436_s2 = inlined_call_operand.vmem [shape: f32[32,1], index: 2, kind: input, shape index: {}]   ;;  %s4437_s3 = inlined_call_operand.vmem [shape: f32[32,32], index: 3, kind: input, shape index: {}]   ;;  %s4438_s4 = inlined_call_operand.vmem [shape: f32[32,1], index: 4, kind: input, shape index: {}]   ;;  %s4439_s5 = inlined_call_operand.vmem [shape: f32[32,32], index: 5, kind: input, shape index: {}]   ;;  %s4440_s6 = inlined_call_operand.vmem [shape: f32[32,1], index: 6, kind: input, shape index: {}]   ;;  %s4441_s7 = inlined_call_operand.vmem [shape: f32[4,32], index: 7, kind: input, shape index: {}]   ;;  %s4442_s8 = inlined_call_operand.vmem [shape: f32[4,1], index: 8, kind: input, shape index: {}]   ;;  %s4443_s9 = inlined_call_operand.hbm [shape: f32[8,1024], index: 9, kind: output, shape index: {}]  }
   0x1   :  { %16 = vsyncpa [#allocation3 + $0x1], 0  ;;  %s3329_s30 = smov 0   ;;  %s3331_s10 = smov 0  }
   0x2   :  { %s3333_s11 = smov 0   ;;  %s3335_s12 = smov 0  }
   0x3 LB: > { %s3350_s13 = sadd.s32 4294967295, %s3267_s12   ;;  %s2846_s14 = sadd.s32 4294967294, %s3267_s12   ;;  %s3267_s12 = sphi %s3335_s12, %s4463_s12   ;;  %s3263_s11 = sphi %s3333_s11, %s4462_s11   ;;  %s3259_s10 = sphi %s3331_s10, %s4461_s10   ;;  %s3255_s30 = sphi %s3329_s30, %s4460_s30  }
   0x4   : > { %s3354_s15 = sadd.s32 1, %s3267_s12   ;;  %s223_s16 = sadd.s32 1, %s3263_s11 }
   0x5   : > { %s220_s17 = ssub.s32 %s3267_s12, %s3354_s15  ;;  %p233_p0 = scmp.ne.s32.totalorder %s3263_s11, %s3259_s10 }
   0x6   : > { %p221_p1 = scmp.eq.s32.totalorder %s220_s17, 0  ;;  %p234_p2 = scmp.eq.s32.totalorder %s3350_s13, 1 }
   0x7   : > { %p239_p3 = scmp.ne.s32.totalorder %s3259_s10, %s3255_s30  ;;  %p240_p4 = scmp.eq.s32.totalorder %s2846_s14, 1 }
   0x8   : > { %s3365_s18 = scalar_select %p221_p1, %s3263_s11, %s223_s16  }
   0x9   : > { %p3367_p5 = por %p234_p2, %p233_p0  ;;  %p3371_p6 = por %p240_p4, %p239_p3 }
   0xa   : > { %p2849_p7 = scmp.ge.s32.totalorder %s3267_s12, 1  ;;  %p291_p8 = scmp.lt.s32.totalorder %s3267_s12, 3 }
   0xc   : > { %p292_p9 = pnand %p2849_p7, %p291_p8 }
   0xd   : > { %s2851_s21 = sshll.u32 (!%p292_p9), %s3350_s13, 6  ;;  %v3269_v36 = vmov (!%p292_p9), 0.0   ;;  %vm554_vm0 = vcmask (!%p292_p9), 64512   ;;  %vm837_vm1 = vcmask (!%p292_p9), 261120   ;;  %vm1662_vm2 = vcmask (!%p292_p9), 1040384   ;;  %s324_s14 = sand.u32 (!%p292_p9), 1, %s3259_s10  }
   0xe   : > { %295 = sbr.rel (%p292_p9) target bundleno = 1526 (0x5f6), region = 56  ;;  %p328_p10 = scmp.lt.s32.totalorder (!%p292_p9), %s2851_s21, 127  ;;  %631 = vmatprep.mubr.f32.mxu0 (!%p292_p9), %v3269_v36  ;;  %720 = vmatprep.mubr.f32.mxu1 (!%p292_p9), %v3269_v36  ;;  %vm1667_vm7 = vcmask (!%p292_p9), 1041408   ;;  %vm1672_vm8 = vcmask (!%p292_p9), 1042432  }
   0xf   : > { %s3674_s16 = sshll.u32 (!%p292_p9), %s324_s14, 5  ;;  %s2773_s26 = scalar_lea.sflag (!%p292_p9), [#allocation3], %s324_s14 }
  0x10   : > { %s3692_s17 = scalar_lea.vmem (!%p292_p9), [#allocation2], %s3674_s16 }
  0x15   : > { %s4465_s21 = smov (!%p328_p10, %s2851_s21), 127 }
  0x16   : > { %s2852_s22 = sshll.u32 %s4465_s21, 3  ;;  %s2922_s21 = sshll.u32 %s3350_s13, 9 }
  0x17   : > { %s3381_s25 = scalar_lea.vmem %s4434_s0, %s2852_s22  ;;  %s2787_s22 = sshll.u32 %s3692_s17, 4  ;;  %s4391_s22 = int_to_ptr.vmem [resolvable:$true] %s2787_s22 }
  0x18   : > { %v382_v0 = vld [vmem:[%s3381_s25 + $0x180] sm:$0xff]  ;;  %v383_v2 = vld [vmem:[%s3381_s25 + $0x188] sm:$0xff]  ;;  %v384_v4 = vld [vmem:[%s3381_s25 + $0x190] sm:$0xff]  ;;  %s3205_s27 = scalar_lea.vmem %s4391_s22, 512  ;;  %s3278_s13 = smov [#allocation2]  }
  0x19   : > { %v350_v1 = vld [vmem:[%s3381_s25 + $0x80] sm:$0xff]  ;;  %494 = vxpose.xlu1.b32.start [1/16] (narrow) %v382_v0, 8  ;;  %v351_v3 = vld [vmem:[%s3381_s25 + $0x88] sm:$0xff]  ;;  %v352_v5 = vld [vmem:[%s3381_s25 + $0x90] sm:$0xff]  ;;  %p3206_p11 = scmp.ne.s32.totalorder %s4391_s22, %s3205_s27  ;;  %s3209_s28 = sshll.u32 %s3278_s13, 4  ;;  %s3210_s28 = int_to_ptr.vmem [resolvable:$false] %s3209_s28 }
  0x1a   : > { %430 = vxpose.xlu0.b32.start [1/16] (narrow) %v350_v1, 8  ;;  %v385_v6 = vld [vmem:[%s3381_s25 + $0x198] sm:$0xff]  ;;  %v386_v8 = vld [vmem:[%s3381_s25 + $0x1a0] sm:$0xff]  ;;  %v387_v10 = vld [vmem:[%s3381_s25 + $0x1a8] sm:$0xff]  ;;  %s3211_s29 = scalar_lea.vmem %s3210_s28, 1024  ;;  %p3212_p0 = scmp.lt.s32.totalorder %s4391_s22, %s3210_s28 }
  0x1b   : > { %v353_v7 = vld [vmem:[%s3381_s25 + $0x98] sm:$0xff]  ;;  %v354_v9 = vld [vmem:[%s3381_s25 + $0xa0] sm:$0xff]  ;;  %v355_v11 = vld [vmem:[%s3381_s25 + $0xa8] sm:$0xff]  ;;  %p3207_p12 = pnand %p3206_p11, %p3367_p5  ;;  %p3213_p1 = scmp.lt.s32.totalorder %s3211_s29, %s3205_s27 }
  0x1c   : > { %v388_v12 = vld [vmem:[%s3381_s25 + $0x1b0] sm:$0xff]  ;;  %v389_v14 = vld [vmem:[%s3381_s25 + $0x1b8] sm:$0xff]  ;;  %v390_v16 = vld [vmem:[%s3381_s25 + $0x1c0] sm:$0xff] }
  0x1d   : > { %495 = vxpose.xlu1.b32.cont [2/16] (narrow) %v383_v2, 8  ;;  %v356_v13 = vld [vmem:[%s3381_s25 + $0xb0] sm:$0xff]  ;;  %v357_v15 = vld [vmem:[%s3381_s25 + $0xb8] sm:$0xff]  ;;  %v358_v17 = vld [vmem:[%s3381_s25 + $0xc0] sm:$0xff]  ;;  %p3208_p13 = pneg %p3207_p12  ;;  %p3214_p2 = por %p3213_p1, %p3212_p0 }
  0x1e   : > { %431 = vxpose.xlu0.b32.cont [2/16] (narrow) %v351_v3, 8  ;;  %v391_v18 = vld [vmem:[%s3381_s25 + $0x1c8] sm:$0xff]  ;;  %v392_v20 = vld [vmem:[%s3381_s25 + $0x1d0] sm:$0xff]  ;;  %v393_v22 = vld [vmem:[%s3381_s25 + $0x1d8] sm:$0xff] }
  0x1f   : > { %v359_v19 = vld [vmem:[%s3381_s25 + $0xc8] sm:$0xff]  ;;  %v360_v21 = vld [vmem:[%s3381_s25 + $0xd0] sm:$0xff]  ;;  %v361_v23 = vld [vmem:[%s3381_s25 + $0xd8] sm:$0xff]  ;;  %p3215_p3 = pnand %p3214_p2, %p3208_p13 }
  0x20   : > { %v394_v24 = vld [vmem:[%s3381_s25 + $0x1e0] sm:$0xff]  ;;  %v395_v26 = vld [vmem:[%s3381_s25 + $0x1e8] sm:$0xff]  ;;  %v396_v28 = vld [vmem:[%s3381_s25 + $0x1f0] sm:$0xff] }
  0x21   : > { %496 = vxpose.xlu1.b32.cont [3/16] (narrow) %v384_v4, 8  ;;  %v362_v25 = vld [vmem:[%s3381_s25 + $0xe0] sm:$0xff]  ;;  %v363_v27 = vld [vmem:[%s3381_s25 + $0xe8] sm:$0xff]  ;;  %v364_v29 = vld [vmem:[%s3381_s25 + $0xf0] sm:$0xff]  ;;  %v3270_v4 = vmov 0  }
  0x22   : > { %432 = vxpose.xlu0.b32.cont [3/16] (narrow) %v352_v5, 8  ;;  %v397_v30 = vld [vmem:[%s3381_s25 + $0x1f8] sm:$0xff]  ;;  %v366_v32 = vld [vmem:[%s3381_s25 + $0x100] sm:$0xff]  ;;  %v367_v34 = vld [vmem:[%s3381_s25 + $0x108] sm:$0xff] }
  0x23   : > { %v365_v31 = vld [vmem:[%s3381_s25 + $0xf8] sm:$0xff]  ;;  %v334_v33 = vld [vmem:[%s3381_s25] sm:$0xff]  ;;  %v335_v35 = vld [vmem:[%s3381_s25 + $0x8] sm:$0xff] }
  0x24   : > { %v368_v37 = vld [vmem:[%s3381_s25 + $0x110] sm:$0xff]  ;;  %v369_v39 = vld [vmem:[%s3381_s25 + $0x118] sm:$0xff]  ;;  %v370_v41 = vld [vmem:[%s3381_s25 + $0x120] sm:$0xff] }
  0x25   : > { %497 = vxpose.xlu1.b32.cont [4/16] (narrow) %v385_v6, 8  ;;  %v336_v38 = vld [vmem:[%s3381_s25 + $0x10] sm:$0xff]  ;;  %v337_v40 = vld [vmem:[%s3381_s25 + $0x18] sm:$0xff]  ;;  %v338_v42 = vld [vmem:[%s3381_s25 + $0x20] sm:$0xff] }
  0x26   : > { %433 = vxpose.xlu0.b32.cont [4/16] (narrow) %v353_v7, 8  ;;  %v371_v43 = vld [vmem:[%s3381_s25 + $0x128] sm:$0xff]  ;;  %v372_v45 = vld [vmem:[%s3381_s25 + $0x130] sm:$0xff]  ;;  %v373_v47 = vld [vmem:[%s3381_s25 + $0x138] sm:$0xff] }
  0x27   : > { %v339_v44 = vld [vmem:[%s3381_s25 + $0x28] sm:$0xff]  ;;  %v340_v46 = vld [vmem:[%s3381_s25 + $0x30] sm:$0xff]  ;;  %v341_v48 = vld [vmem:[%s3381_s25 + $0x38] sm:$0xff] }
  0x28   : > { %v374_v49 = vld [vmem:[%s3381_s25 + $0x140] sm:$0xff]  ;;  %v375_v51 = vld [vmem:[%s3381_s25 + $0x148] sm:$0xff]  ;;  %v376_v53 = vld [vmem:[%s3381_s25 + $0x150] sm:$0xff] }
  0x29   : > { %498 = vxpose.xlu1.b32.cont [5/16] (narrow) %v386_v8, 8  ;;  %v342_v50 = vld [vmem:[%s3381_s25 + $0x40] sm:$0xff]  ;;  %v343_v52 = vld [vmem:[%s3381_s25 + $0x48] sm:$0xff]  ;;  %v344_v54 = vld [vmem:[%s3381_s25 + $0x50] sm:$0xff] }
  0x2a   : > { %434 = vxpose.xlu0.b32.cont [5/16] (narrow) %v354_v9, 8  ;;  %v377_v55 = vld [vmem:[%s3381_s25 + $0x158] sm:$0xff]  ;;  %v378_v57 = vld [vmem:[%s3381_s25 + $0x160] sm:$0xff]  ;;  %v379_v59 = vld [vmem:[%s3381_s25 + $0x168] sm:$0xff] }
  0x2b   : > { %v345_v56 = vld [vmem:[%s3381_s25 + $0x58] sm:$0xff]  ;;  %v346_v58 = vld [vmem:[%s3381_s25 + $0x60] sm:$0xff]  ;;  %v347_v60 = vld [vmem:[%s3381_s25 + $0x68] sm:$0xff] }
  0x2c   : > { %v380_v61 = vld [vmem:[%s3381_s25 + $0x170] sm:$0xff]  ;;  %v381_v63 = vld [vmem:[%s3381_s25 + $0x178] sm:$0xff]  ;;  %v531_v3 = vld [vmem:[%s4436_s2 + $0x8] sm:$0xff] }
  0x2d   : > { %499 = vxpose.xlu1.b32.cont [6/16] (narrow) %v387_v10, 8  ;;  %v348_v62 = vld [vmem:[%s3381_s25 + $0x70] sm:$0xff]  ;;  %v349_v0 = vld [vmem:[%s3381_s25 + $0x78] sm:$0xff]  ;;  %v530_v7 = vld [vmem:[%s4436_s2] sm:$0xff]  ;;  %s4389_s25 = scalar_lea.hbm %s4443_s9, %s2922_s21 }
  0x2e   : > { %435 = vxpose.xlu0.b32.cont [6/16] (narrow) %v355_v11, 8  ;;  %v532_v5 = vld [vmem:[%s4436_s2 + $0x10] sm:$0xff]  ;;  %v533_v6 = vld [vmem:[%s4436_s2 + $0x18] sm:$0xff]  ;;  %v813_v8 = vld [vmem:[%s4438_s4] sm:$0xff] }
  0x2f   : > { %v814_v9 = vld [vmem:[%s4438_s4 + $0x8] sm:$0xff]  ;;  %v815_v10 = vld [vmem:[%s4438_s4 + $0x10] sm:$0xff]  ;;  %v816_v11 = vld [vmem:[%s4438_s4 + $0x18] sm:$0xff] }
  0x31   : > { %500 = vxpose.xlu1.b32.cont [7/16] (narrow) %v388_v12, 8  ;;  %v1096_v12 = vld [vmem:[%s4440_s6] sm:$0xff] }
  0x32   : > { %436 = vxpose.xlu0.b32.cont [7/16] (narrow) %v356_v13, 8  ;;  %v1097_v13 = vld [vmem:[%s4440_s6 + $0x8] sm:$0xff] }
  0x35   : > { %501 = vxpose.xlu1.b32.cont [8/16] (narrow) %v389_v14, 8  ;;  %v1098_v14 = vld [vmem:[%s4440_s6 + $0x10] sm:$0xff] }
  0x36   : > { %437 = vxpose.xlu0.b32.cont [8/16] (narrow) %v357_v15, 8  ;;  %v1099_v15 = vld [vmem:[%s4440_s6 + $0x18] sm:$0xff] }
  0x39   : > { %502 = vxpose.xlu1.b32.cont [9/16] (narrow) %v390_v16, 8  ;;  %v1375_v16 = vld [vmem:[%s4442_s8] sm:$0xf] }
  0x3a   : > { %438 = vxpose.xlu0.b32.cont [9/16] (narrow) %v358_v17, 8  ;;  %v526_v17 = vld [vmem:[%s4435_s1] sm:$0xff] }
  0x3d   : > { %503 = vxpose.xlu1.b32.cont [10/16] (narrow) %v391_v18, 8 }
  0x3e   : > { %439 = vxpose.xlu0.b32.cont [10/16] (narrow) %v359_v19, 8 }
  0x41   : > { %504 = vxpose.xlu1.b32.cont [11/16] (narrow) %v392_v20, 8  ;;  %v527_v20 = vld [vmem:[%s4435_s1 + $0x8] sm:$0xff] }
  0x42   : > { %440 = vxpose.xlu0.b32.cont [11/16] (narrow) %v360_v21, 8  ;;  %v528_v21 = vld [vmem:[%s4435_s1 + $0x10] sm:$0xff] }
  0x45   : > { %505 = vxpose.xlu1.b32.cont [12/16] (narrow) %v393_v22, 8  ;;  %v529_v22 = vld [vmem:[%s4435_s1 + $0x18] sm:$0xff] }
  0x46   : > { %441 = vxpose.xlu0.b32.cont [12/16] (narrow) %v361_v23, 8 }
  0x49   : > { %506 = vxpose.xlu1.b32.cont [13/16] (narrow) %v394_v24, 8 }
  0x4a   : > { %442 = vxpose.xlu0.b32.cont [13/16] (narrow) %v362_v25, 8 }
  0x4d   : > { %507 = vxpose.xlu1.b32.cont [14/16] (narrow) %v395_v26, 8 }
  0x4e   : > { %443 = vxpose.xlu0.b32.cont [14/16] (narrow) %v363_v27, 8 }
  0x51   : > { %508 = vxpose.xlu1.b32.cont [15/16] (narrow) %v396_v28, 8 }
  0x52   : > { %444 = vxpose.xlu0.b32.cont [15/16] (narrow) %v364_v29, 8 }
  0x55   : > { %509 = vxpose.xlu1.b32.end [16/16] (narrow) %v397_v30, 8 }
  0x56   : > { %445 = vxpose.xlu0.b32.end [16/16] (narrow) %v365_v31, 8 }
  0x59   : > { %462 = vxpose.xlu1.b32.start [1/16] (narrow) %v366_v32, 8 }
  0x5a   : > { %398 = vxpose.xlu0.b32.start [1/16] (narrow) %v334_v33, 8 }
  0x5d   : > { %463 = vxpose.xlu1.b32.cont [2/16] (narrow) %v367_v34, 8 }
  0x5e   : > { %399 = vxpose.xlu0.b32.cont [2/16] (narrow) %v335_v35, 8 }
  0x61   : > { %464 = vxpose.xlu1.b32.cont [3/16] (narrow) %v368_v37, 8 }
  0x62   : > { %400 = vxpose.xlu0.b32.cont [3/16] (narrow) %v336_v38, 8 }
  0x65   : > { %465 = vxpose.xlu1.b32.cont [4/16] (narrow) %v369_v39, 8 }
  0x66   : > { %401 = vxpose.xlu0.b32.cont [4/16] (narrow) %v337_v40, 8 }
  0x69   : > { %466 = vxpose.xlu1.b32.cont [5/16] (narrow) %v370_v41, 8 }
  0x6a   : > { %402 = vxpose.xlu0.b32.cont [5/16] (narrow) %v338_v42, 8 }
  0x6d   : > { %467 = vxpose.xlu1.b32.cont [6/16] (narrow) %v371_v43, 8 }
  0x6e   : > { %403 = vxpose.xlu0.b32.cont [6/16] (narrow) %v339_v44, 8 }
  0x71   : > { %468 = vxpose.xlu1.b32.cont [7/16] (narrow) %v372_v45, 8 }
  0x72   : > { %404 = vxpose.xlu0.b32.cont [7/16] (narrow) %v340_v46, 8 }
  0x75   : > { %469 = vxpose.xlu1.b32.cont [8/16] (narrow) %v373_v47, 8 }
  0x76   : > { %405 = vxpose.xlu0.b32.cont [8/16] (narrow) %v341_v48, 8 }
  0x79   : > { %470 = vxpose.xlu1.b32.cont [9/16] (narrow) %v374_v49, 8 }
  0x7a   : > { %406 = vxpose.xlu0.b32.cont [9/16] (narrow) %v342_v50, 8 }
  0x7d   : > { %471 = vxpose.xlu1.b32.cont [10/16] (narrow) %v375_v51, 8 }
  0x7e   : > { %407 = vxpose.xlu0.b32.cont [10/16] (narrow) %v343_v52, 8 }
  0x81   : > { %472 = vxpose.xlu1.b32.cont [11/16] (narrow) %v376_v53, 8 }
  0x82   : > { %408 = vxpose.xlu0.b32.cont [11/16] (narrow) %v344_v54, 8 }
  0x85   : > { %473 = vxpose.xlu1.b32.cont [12/16] (narrow) %v377_v55, 8 }
  0x86   : > { %409 = vxpose.xlu0.b32.cont [12/16] (narrow) %v345_v56, 8 }
  0x89   : > { %474 = vxpose.xlu1.b32.cont [13/16] (narrow) %v378_v57, 8 }
  0x8a   : > { %410 = vxpose.xlu0.b32.cont [13/16] (narrow) %v346_v58, 8 }
  0x8d   : > { %475 = vxpose.xlu1.b32.cont [14/16] (narrow) %v379_v59, 8 }
  0x8e   : > { %411 = vxpose.xlu0.b32.cont [14/16] (narrow) %v347_v60, 8 }
  0x91   : > { %476 = vxpose.xlu1.b32.cont [15/16] (narrow) %v380_v61, 8 }
  0x92   : > { %412 = vxpose.xlu0.b32.cont [15/16] (narrow) %v348_v62, 8 }
  0x95   : > { %477 = vxpose.xlu1.b32.end [16/16] (narrow) %v381_v63, 8 }
  0x96   : > { %413 = vxpose.xlu0.b32.end [16/16] (narrow) %v349_v0, 8 }
  0x99   : > { %v3449_v1 = vpop.trf.xlu1 }
  0x9a   : > { %v3451_v2 = vpop.trf.xlu0  ;;  %656 = vmatprep.subr.mxu1 %v3449_v1 }
  0x9b   : > { %567 = vmatprep.subr.mxu0 %v3451_v2 }
  0xb3   : > { %3052 = vset.pattern.permute.xlu1 %v3270_v4 }
  0xb4   : > { %541 = vperm.xlu1 %3052, %v531_v3  }
  0xb8   : > { %546 = vperm.xlu1 %3052, %v532_v5  }
  0xbc   : > { %551 = vperm.xlu1 %3052, %v533_v6  }
  0xbf   : > { %3051 = vset.pattern.permute.xlu0 %v3270_v4 }
  0xc0   : > { %536 = vperm.xlu0 %3051, %v530_v7   ;;  %819 = vperm.xlu1 %3052, %v813_v8  }
  0xc4   : > { %824 = vperm.xlu0 %3051, %v814_v9   ;;  %829 = vperm.xlu1 %3052, %v815_v10  }
  0xc8   : > { %834 = vperm.xlu0 %3051, %v816_v11   ;;  %1102 = vperm.xlu1 %3052, %v1096_v12  }
  0xcc   : > { %1107 = vperm.xlu0 %3051, %v1097_v13   ;;  %1112 = vperm.xlu1 %3052, %v1098_v14  }
  0xd0   : > { %1117 = vperm.xlu0 %3051, %v1099_v15   ;;  %1378 = vperm.xlu1 %3052, %v1375_v16  }
  0xd9   : > { %v3497_v18 = vpop.trf.xlu1 }
  0xda   : > { %v3499_v19 = vpop.trf.xlu0  ;;  %657 = vmatpush1.msra.mxu1 %v3497_v18 }
  0xdb   : > { %568 = vmatpush1.msra.mxu0 %v3499_v19  ;;  %2857 = vmatmul.mubr.msk.f32.vlgmr.msra.gmra.mrb[0].mxu1 %vm554_vm0, %v526_v17 }
  0xdc   : > { %2853 = vmatmul.mubr.msk.f32.vlgmr.msra.gmra.mrb[0].mxu0 %vm554_vm0, %v526_v17  ;;  %726 = vmatprep.mubr.f32.mxu1 %v3269_v36 }
  0xdd   : > { %637 = vmatprep.mubr.f32.mxu0 %v3269_v36 }
  0xdf   : > { %2858 = vmatmul.mubr.msk.f32.gmra.mrb[2].mxu1 %vm554_vm0, %v527_v20 }
  0xe0   : > { %2854 = vmatmul.mubr.msk.f32.gmra.mrb[2].mxu0 %vm554_vm0, %v527_v20  ;;  %732 = vmatprep.mubr.f32.mxu1 %v3269_v36 }
  0xe1   : > { %643 = vmatprep.mubr.f32.mxu0 %v3269_v36 }
  0xe3   : > { %2859 = vmatmul.mubr.msk.f32.gmra.mrb[4].mxu1 %vm554_vm0, %v528_v21 }
  0xe4   : > { %2855 = vmatmul.mubr.msk.f32.gmra.mrb[4].mxu0 %vm554_vm0, %v528_v21  ;;  %738 = vmatprep.mubr.f32.mxu1 %v3269_v36 }
  0xe5   : > { %649 = vmatprep.mubr.f32.mxu0 %v3269_v36 }
  0xe7   : > { %2860 = vmatmul.mubr.msk.f32.gmra.mrb[6].mxu1 %vm554_vm0, %v529_v22 }
  0xe8   : > { %2856 = vmatmul.mubr.msk.f32.gmra.mrb[6].mxu0 %vm554_vm0, %v529_v22  ;;  %1003 = vmatprep.mubr.f32.mxu1 %v3269_v36 }
  0xe9   : > { %914 = vmatprep.mubr.f32.mxu0 %v3269_v36 }
 0x133   : > { %v542_v23 = vpop.permute.xlu1 %541 }
 0x137   : > { %v547_v33 = vpop.permute.xlu1 %546 }
 0x13b   : > { %v552_v59 = vpop.permute.xlu1 %551 }
 0x13f   : > { %v537_v24 = vpop.permute.xlu0 %536 }
 0x1ae   : > { %v722_v26 = vpop.f32.mrb[0].mxu1 }
 0x1af   : > { %v633_v25 = vpop.f32.mrb[0].mxu0  ;;  %v723_v28 = vadd.f32 %v722_v26, %v537_v24  ;;  %v724_v29 = vpop.f32.mrb[1].mxu1 }
 0x1b0   : > { %v634_v27 = vadd.f32 %v633_v25, %v537_v24  ;;  %v635_v30 = vpop.f32.mrb[1].mxu0  ;;  %v725_v31 = vadd.f32 %v724_v29, %v537_v24 }
 0x1b1   : > { %v636_v32 = vadd.f32 %v635_v30, %v537_v24  ;;  %v747_v35 = vmul.f32 0.5, %v723_v28 }
 0x1b2   : > { %v745_v34 = vmul.f32 0.5, %v634_v27  ;;  %v748_v37 = vmul.f32 0.5, %v725_v31  ;;  %v728_v40 = vpop.f32.mrb[2].mxu1 }
 0x1b3   : > { %v746_v38 = vmul.f32 0.5, %v636_v32  ;;  %v639_v39 = vpop.f32.mrb[2].mxu0  ;;  %v729_v42 = vadd.f32 %v728_v40, %v542_v23  ;;  %v730_v43 = vpop.f32.mrb[3].mxu1 }
 0x1b4   : > { %3053 = vtanh.f32 %v745_v34  ;;  %v640_v41 = vadd.f32 %v639_v39, %v542_v23  ;;  %v641_v44 = vpop.f32.mrb[3].mxu0  ;;  %v731_v45 = vadd.f32 %v730_v43, %v542_v23 }
 0x1b5   : > { %3055 = vtanh.f32 %v747_v35  ;;  %v642_v46 = vadd.f32 %v641_v44, %v542_v23  ;;  %v751_v48 = vmul.f32 0.5, %v729_v42 }
 0x1b6   : > { %3057 = vtanh.f32 %v748_v37  ;;  %v749_v47 = vmul.f32 0.5, %v640_v41  ;;  %v752_v49 = vmul.f32 0.5, %v731_v45  ;;  %v734_v52 = vpop.f32.mrb[4].mxu1 }
 0x1b7   : > { %3059 = vtanh.f32 %v746_v38  ;;  %v750_v50 = vmul.f32 0.5, %v642_v46  ;;  %v645_v51 = vpop.f32.mrb[4].mxu0  ;;  %v735_v54 = vadd.f32 %v734_v52, %v547_v33  ;;  %v736_v56 = vpop.f32.mrb[5].mxu1 }
 0x1b8   : > { %3061 = vtanh.f32 %v749_v47  ;;  %v646_v53 = vadd.f32 %v645_v51, %v547_v33  ;;  %v647_v55 = vpop.f32.mrb[5].mxu0  ;;  %v737_v58 = vadd.f32 %v736_v56, %v547_v33 }
 0x1b9   : > { %3063 = vtanh.f32 %v751_v48  ;;  %v648_v57 = vadd.f32 %v647_v55, %v547_v33  ;;  %v755_v61 = vmul.f32 0.5, %v735_v54 }
 0x1ba   : > { %3065 = vtanh.f32 %v752_v49  ;;  %v753_v60 = vmul.f32 0.5, %v646_v53  ;;  %v756_v63 = vmul.f32 0.5, %v737_v58  ;;  %v740_v3 = vpop.f32.mrb[6].mxu1 }
 0x1bb   : > { %3067 = vtanh.f32 %v750_v50  ;;  %v754_v62 = vmul.f32 0.5, %v648_v57  ;;  %v651_v0 = vpop.f32.mrb[6].mxu0  ;;  %v741_v5 = vadd.f32 %v740_v3, %v552_v59  ;;  %v742_v7 = vpop.f32.mrb[7].mxu1 }
 0x1bc   : > { %3069 = vtanh.f32 %v753_v60  ;;  %v652_v4 = vadd.f32 %v651_v0, %v552_v59  ;;  %v653_v6 = vpop.f32.mrb[7].mxu0  ;;  %v743_v9 = vadd.f32 %v742_v7, %v552_v59 }
 0x1bd   : > { %3071 = vtanh.f32 %v755_v61  ;;  %v654_v8 = vadd.f32 %v653_v6, %v552_v59  ;;  %v759_v12 = vmul.f32 0.5, %v741_v5 }
 0x1be   : > { %v3054_v10 = vpop.eup %3053  ;;  %3073 = vtanh.f32 %v754_v62  ;;  %v757_v11 = vmul.f32 0.5, %v652_v4  ;;  %v760_v15 = vmul.f32 0.5, %v743_v9 }
 0x1bf   : > { %v3056_v13 = vpop.eup %3055  ;;  %3075 = vtanh.f32 %v756_v63  ;;  %v758_v14 = vmul.f32 0.5, %v654_v8  ;;  %v777_v20 = vmul.f32 0.5, %v3054_v10 }
 0x1c0   : > { %v3058_v16 = vpop.eup %3057  ;;  %3077 = vtanh.f32 %v757_v11  ;;  %v779_v22 = vmul.f32 0.5, %v3056_v13  ;;  %v809_v11 = vld [vmem:[%s4437_s3] sm:$0xff]  ;;  %v811_v13 = vld [vmem:[%s4437_s3 + $0x10] sm:$0xff] }
 0x1c1   : > { %v3060_v17 = vpop.eup %3059  ;;  %3079 = vtanh.f32 %v759_v12  ;;  %v780_v24 = vmul.f32 0.5, %v3058_v16  ;;  %v793_v30 = vadd.f32 0.5, %v777_v20  ;;  %v810_v12 = vld [vmem:[%s4437_s3 + $0x8] sm:$0xff] }
 0x1c2   : > { %v3062_v21 = vpop.eup %3061  ;;  %3081 = vtanh.f32 %v758_v14  ;;  %v778_v27 = vmul.f32 0.5, %v3060_v17  ;;  %v795_v34 = vadd.f32 0.5, %v779_v22  ;;  %v812_v14 = vld [vmem:[%s4437_s3 + $0x18] sm:$0xff] }
 0x1c3   : > { %v3064_v23 = vpop.eup %3063  ;;  %v781_v25 = vmul.f32 0.5, %v3062_v21  ;;  %3083 = vtanh.f32 %v760_v15  ;;  %v796_v39 = vadd.f32 0.5, %v780_v24  ;;  %v820_v15 = vpop.permute.xlu1 %819 }
 0x1c4   : > { %v3066_v26 = vpop.eup %3065  ;;  %v783_v28 = vmul.f32 0.5, %v3064_v23  ;;  %v794_v43 = vadd.f32 0.5, %v778_v27  ;;  %v825_v27 = vpop.permute.xlu0 %824 }
 0x1c5   : > { %v3068_v29 = vpop.eup %3067  ;;  %v797_v31 = vadd.f32 0.5, %v781_v25  ;;  %v784_v32 = vmul.f32 0.5, %v3066_v26 }
 0x1c6   : > { %v3070_v33 = vpop.eup %3069  ;;  %v799_v35 = vadd.f32 0.5, %v783_v28  ;;  %v782_v37 = vmul.f32 0.5, %v3068_v29 }
 0x1c7   : > { %v3072_v38 = vpop.eup %3071  ;;  %v2925_v40 = vpack.c.bf16 %v797_v31, %v793_v30  ;;  %v800_v41 = vadd.f32 0.5, %v784_v32  ;;  %v785_v47 = vmul.f32 0.5, %v3070_v33 }
 0x1c8   : > { %v3074_v42 = vpop.eup %3073  ;;  %v2933_v44 = vpack.c.bf16 %v799_v35, %v795_v34  ;;  %v798_v45 = vadd.f32 0.5, %v782_v37  ;;  %v787_v50 = vmul.f32 0.5, %v3072_v38 }
 0x1c9   : > { %v3076_v46 = vpop.eup %3075  ;;  %v2931_v48 = vpack.c.bf16 %v800_v41, %v796_v39  ;;  %v786_v53 = vmul.f32 0.5, %v3074_v42  ;;  %v801_v59 = vadd.f32 0.5, %v785_v47  ;;  %v830_v41 = vpop.permute.xlu1 %829 }
 0x1ca   : > { %v3078_v49 = vpop.eup %3077  ;;  %v2923_v51 = vpack.c.bf16 %v798_v45, %v794_v43  ;;  %v788_v56 = vmul.f32 0.5, %v3076_v46  ;;  %v803_v62 = vadd.f32 0.5, %v787_v50 }
 0x1cb   : > { %v3080_v52 = vpop.eup %3079  ;;  %v789_v54 = vmul.f32 0.5, %v3078_v49  ;;  %2932 = vmatprep.subr.bf16.mxu1 %v2931_v48  ;;  %v802_v3 = vadd.f32 0.5, %v786_v53 }
 0x1cc   : > { %v3082_v55 = vpop.eup %3081  ;;  %v791_v57 = vmul.f32 0.5, %v3080_v52  ;;  %2924 = vmatprep.subr.bf16.mxu0 %v2923_v51  ;;  %2934 = vmatpush1.bf16.msra.mxu1 %v2933_v44  ;;  %v804_v6 = vadd.f32 0.5, %v788_v56 }
 0x1cd   : > { %v3084_v58 = vpop.eup %3083  ;;  %v805_v60 = vadd.f32 0.5, %v789_v54  ;;  %v790_v61 = vmul.f32 0.5, %v3082_v55  ;;  %2926 = vmatpush1.bf16.msra.mxu0 %v2925_v40  ;;  %v835_v54 = vpop.permute.xlu0 %834 }
 0x1ce   : > { %v807_v63 = vadd.f32 0.5, %v791_v57  ;;  %v792_v0 = vmul.f32 0.5, %v3084_v58 }
 0x1cf   : > { %v2929_v4 = vpack.c.bf16 %v805_v60, %v801_v59  ;;  %v806_v5 = vadd.f32 0.5, %v790_v61 }
 0x1d0   : > { %v2937_v7 = vpack.c.bf16 %v807_v63, %v803_v62  ;;  %v808_v8 = vadd.f32 0.5, %v792_v0 }
 0x1d1   : > { %v2927_v9 = vpack.c.bf16 %v806_v5, %v802_v3 }
 0x1d2   : > { %v2935_v10 = vpack.c.bf16 %v808_v8, %v804_v6 }
 0x1d3   : > { %2928 = vmatprep.subr.bf16.mxu0 %v2927_v9 }
 0x1d4   : > { %2936 = vmatprep.subr.bf16.mxu1 %v2935_v10  ;;  %2930 = vmatpush1.bf16.msra.mxu0 %v2929_v4 }
 0x1d5   : > { %2938 = vmatpush1.bf16.msra.mxu1 %v2937_v7 }
 0x1d7   : > { %2861 = vmatmul.mubr.msk.f32.vlgmr.msra.gmra.mrb[8].mxu0 %vm837_vm1, %v809_v11 }
 0x1d8   : > { %2865 = vmatmul.mubr.msk.f32.vlgmr.msra.gmra.mrb[8].mxu1 %vm837_vm1, %v809_v11  ;;  %920 = vmatprep.mubr.f32.mxu0 %v3269_v36 }
 0x1d9   : > { %1009 = vmatprep.mubr.f32.mxu1 %v3269_v36 }
 0x1db   : > { %2862 = vmatmul.mubr.msk.f32.gmra.mrb[10].mxu0 %vm837_vm1, %v810_v12 }
 0x1dc   : > { %2866 = vmatmul.mubr.msk.f32.gmra.mrb[10].mxu1 %vm837_vm1, %v810_v12  ;;  %926 = vmatprep.mubr.f32.mxu0 %v3269_v36 }
 0x1dd   : > { %1015 = vmatprep.mubr.f32.mxu1 %v3269_v36 }
 0x1df   : > { %2863 = vmatmul.mubr.msk.f32.gmra.mrb[12].mxu0 %vm837_vm1, %v811_v13 }
 0x1e0   : > { %2867 = vmatmul.mubr.msk.f32.gmra.mrb[12].mxu1 %vm837_vm1, %v811_v13  ;;  %932 = vmatprep.mubr.f32.mxu0 %v3269_v36 }
 0x1e1   : > { %1021 = vmatprep.mubr.f32.mxu1 %v3269_v36 }
 0x1e3   : > { %2864 = vmatmul.mubr.msk.f32.gmra.mrb[14].mxu0 %vm837_vm1, %v812_v14 }
 0x1e4   : > { %2868 = vmatmul.mubr.msk.f32.gmra.mrb[14].mxu1 %vm837_vm1, %v812_v14  ;;  %1196 = vmatprep.mubr.f32.mxu0 %v3269_v36 }
 0x1e5   : > { %1285 = vmatprep.mubr.f32.mxu1 %v3269_v36 }
 0x2aa   : > { %v916_v16 = vpop.f32.mrb[8].mxu0 }
 0x2ab   : > { %v917_v17 = vadd.f32 %v916_v16, %v820_v15  ;;  %v1005_v20 = vpop.f32.mrb[8].mxu1  ;;  %v918_v21 = vpop.f32.mrb[9].mxu0 }
 0x2ac   : > { %v1006_v22 = vadd.f32 %v1005_v20, %v820_v15  ;;  %v919_v23 = vadd.f32 %v918_v21, %v820_v15  ;;  %v1007_v24 = vpop.f32.mrb[9].mxu1 }
 0x2ad   : > { %v1028_v25 = vmul.f32 0.5, %v917_v17  ;;  %v1008_v26 = vadd.f32 %v1007_v24, %v820_v15 }
 0x2ae   : > { %v1030_v28 = vmul.f32 0.5, %v1006_v22  ;;  %v1029_v29 = vmul.f32 0.5, %v919_v23  ;;  %v922_v30 = vpop.f32.mrb[10].mxu0 }
 0x2af   : > { %3085 = vtanh.f32 %v1028_v25  ;;  %v1031_v31 = vmul.f32 0.5, %v1008_v26  ;;  %v923_v32 = vadd.f32 %v922_v30, %v825_v27  ;;  %v1011_v33 = vpop.f32.mrb[10].mxu1  ;;  %v924_v34 = vpop.f32.mrb[11].mxu0 }
 0x2b0   : > { %3087 = vtanh.f32 %v1030_v28  ;;  %v1012_v35 = vadd.f32 %v1011_v33, %v825_v27  ;;  %v925_v37 = vadd.f32 %v924_v34, %v825_v27  ;;  %v1013_v38 = vpop.f32.mrb[11].mxu1 }
 0x2b1   : > { %3089 = vtanh.f32 %v1029_v29  ;;  %v1032_v39 = vmul.f32 0.5, %v923_v32  ;;  %v1014_v40 = vadd.f32 %v1013_v38, %v825_v27 }
 0x2b2   : > { %3091 = vtanh.f32 %v1031_v31  ;;  %v1034_v42 = vmul.f32 0.5, %v1012_v35  ;;  %v1033_v43 = vmul.f32 0.5, %v925_v37  ;;  %v928_v44 = vpop.f32.mrb[12].mxu0 }
 0x2b3   : > { %3093 = vtanh.f32 %v1032_v39  ;;  %v1035_v45 = vmul.f32 0.5, %v1014_v40  ;;  %v929_v46 = vadd.f32 %v928_v44, %v830_v41  ;;  %v1017_v47 = vpop.f32.mrb[12].mxu1  ;;  %v930_v48 = vpop.f32.mrb[13].mxu0 }
 0x2b4   : > { %3095 = vtanh.f32 %v1034_v42  ;;  %v1018_v49 = vadd.f32 %v1017_v47, %v830_v41  ;;  %v931_v50 = vadd.f32 %v930_v48, %v830_v41  ;;  %v1019_v51 = vpop.f32.mrb[13].mxu1 }
 0x2b5   : > { %3097 = vtanh.f32 %v1033_v43  ;;  %v1036_v52 = vmul.f32 0.5, %v929_v46  ;;  %v1020_v53 = vadd.f32 %v1019_v51, %v830_v41 }
 0x2b6   : > { %3099 = vtanh.f32 %v1035_v45  ;;  %v1038_v55 = vmul.f32 0.5, %v1018_v49  ;;  %v1037_v56 = vmul.f32 0.5, %v931_v50  ;;  %v934_v57 = vpop.f32.mrb[14].mxu0 }
 0x2b7   : > { %3101 = vtanh.f32 %v1036_v52  ;;  %v1039_v58 = vmul.f32 0.5, %v1020_v53  ;;  %v935_v59 = vadd.f32 %v934_v57, %v835_v54  ;;  %v1023_v60 = vpop.f32.mrb[14].mxu1  ;;  %v936_v61 = vpop.f32.mrb[15].mxu0 }
 0x2b8   : > { %3103 = vtanh.f32 %v1038_v55  ;;  %v1024_v62 = vadd.f32 %v1023_v60, %v835_v54  ;;  %v937_v63 = vadd.f32 %v936_v61, %v835_v54  ;;  %v1025_v0 = vpop.f32.mrb[15].mxu1 }
 0x2b9   : > { %v3086_v3 = vpop.eup %3085  ;;  %3105 = vtanh.f32 %v1037_v56  ;;  %v1040_v4 = vmul.f32 0.5, %v935_v59  ;;  %v1026_v5 = vadd.f32 %v1025_v0, %v835_v54 }
 0x2ba   : > { %v3088_v6 = vpop.eup %3087  ;;  %3107 = vtanh.f32 %v1039_v58  ;;  %v1042_v7 = vmul.f32 0.5, %v1024_v62  ;;  %v1041_v8 = vmul.f32 0.5, %v937_v63  ;;  %v1060_v12 = vmul.f32 0.5, %v3086_v3 }
 0x2bb   : > { %v3090_v9 = vpop.eup %3089  ;;  %3109 = vtanh.f32 %v1040_v4  ;;  %v1043_v10 = vmul.f32 0.5, %v1026_v5  ;;  %v1062_v14 = vmul.f32 0.5, %v3088_v6  ;;  %v1092_v5 = vld [vmem:[%s4439_s5] sm:$0xff]  ;;  %v1093_v6 = vld [vmem:[%s4439_s5 + $0x8] sm:$0xff] }
 0x2bc   : > { %v3092_v11 = vpop.eup %3091  ;;  %3111 = vtanh.f32 %v1042_v7  ;;  %v1061_v16 = vmul.f32 0.5, %v3090_v9  ;;  %v1076_v24 = vadd.f32 0.5, %v1060_v12  ;;  %v1094_v7 = vld [vmem:[%s4439_s5 + $0x10] sm:$0xff]  ;;  %v1103_v9 = vpop.permute.xlu1 %1102 }
 0x2bd   : > { %v3094_v13 = vpop.eup %3093  ;;  %3113 = vtanh.f32 %v1041_v8  ;;  %v1063_v21 = vmul.f32 0.5, %v3092_v11  ;;  %v1078_v28 = vadd.f32 0.5, %v1062_v14  ;;  %v1095_v8 = vld [vmem:[%s4439_s5 + $0x18] sm:$0xff] }
 0x2be   : > { %v3096_v15 = vpop.eup %3095  ;;  %v1064_v17 = vmul.f32 0.5, %v3094_v13  ;;  %3115 = vtanh.f32 %v1043_v10  ;;  %v1077_v32 = vadd.f32 0.5, %v1061_v16 }
 0x2bf   : > { %v3098_v20 = vpop.eup %3097  ;;  %v1066_v22 = vmul.f32 0.5, %v3096_v15  ;;  %v1079_v37 = vadd.f32 0.5, %v1063_v21  ;;  %v1108_v21 = vpop.permute.xlu0 %1107 }
 0x2c0   : > { %v3100_v23 = vpop.eup %3099  ;;  %v1080_v25 = vadd.f32 0.5, %v1064_v17  ;;  %v1065_v26 = vmul.f32 0.5, %v3098_v20 }
 0x2c1   : > { %v3102_v27 = vpop.eup %3101  ;;  %v1082_v29 = vadd.f32 0.5, %v1066_v22  ;;  %v1067_v30 = vmul.f32 0.5, %v3100_v23 }
 0x2c2   : > { %v3104_v31 = vpop.eup %3103  ;;  %v2941_v33 = vpack.c.bf16 %v1080_v25, %v1076_v24  ;;  %v1081_v34 = vadd.f32 0.5, %v1065_v26  ;;  %v1068_v41 = vmul.f32 0.5, %v3102_v27 }
 0x2c3   : > { %v3106_v35 = vpop.eup %3105  ;;  %v2949_v38 = vpack.c.bf16 %v1082_v29, %v1078_v28  ;;  %v1083_v39 = vadd.f32 0.5, %v1067_v30  ;;  %v1070_v44 = vmul.f32 0.5, %v3104_v31 }
 0x2c4   : > { %v3108_v40 = vpop.eup %3107  ;;  %v2939_v42 = vpack.c.bf16 %v1081_v34, %v1077_v32  ;;  %v1069_v47 = vmul.f32 0.5, %v3106_v35  ;;  %v1084_v53 = vadd.f32 0.5, %v1068_v41  ;;  %v1113_v34 = vpop.permute.xlu1 %1112 }
 0x2c5   : > { %v3110_v43 = vpop.eup %3109  ;;  %v2947_v45 = vpack.c.bf16 %v1083_v39, %v1079_v37  ;;  %v1071_v50 = vmul.f32 0.5, %v3108_v40  ;;  %v1086_v56 = vadd.f32 0.5, %v1070_v44 }
 0x2c6   : > { %v3112_v46 = vpop.eup %3111  ;;  %v1072_v48 = vmul.f32 0.5, %v3110_v43  ;;  %2940 = vmatprep.subr.bf16.mxu0 %v2939_v42  ;;  %v1085_v59 = vadd.f32 0.5, %v1069_v47 }
 0x2c7   : > { %v3114_v49 = vpop.eup %3113  ;;  %v1074_v51 = vmul.f32 0.5, %v3112_v46  ;;  %2948 = vmatprep.subr.bf16.mxu1 %v2947_v45  ;;  %2942 = vmatpush1.bf16.msra.mxu0 %v2941_v33  ;;  %v1087_v62 = vadd.f32 0.5, %v1071_v50 }
 0x2c8   : > { %v3116_v52 = vpop.eup %3115  ;;  %v1088_v54 = vadd.f32 0.5, %v1072_v48  ;;  %v1073_v55 = vmul.f32 0.5, %v3114_v49  ;;  %2950 = vmatpush1.bf16.msra.mxu1 %v2949_v38  ;;  %v1118_v48 = vpop.permute.xlu0 %1117 }
 0x2c9   : > { %v1090_v57 = vadd.f32 0.5, %v1074_v51  ;;  %v1075_v58 = vmul.f32 0.5, %v3116_v52 }
 0x2ca   : > { %v2945_v60 = vpack.c.bf16 %v1088_v54, %v1084_v53  ;;  %v1089_v61 = vadd.f32 0.5, %v1073_v55 }
 0x2cb   : > { %v2953_v63 = vpack.c.bf16 %v1090_v57, %v1086_v56  ;;  %v1091_v0 = vadd.f32 0.5, %v1075_v58 }
 0x2cc   : > { %v2943_v3 = vpack.c.bf16 %v1089_v61, %v1085_v59 }
 0x2cd   : > { %v2951_v4 = vpack.c.bf16 %v1091_v0, %v1087_v62 }
 0x2ce   : > { %2944 = vmatprep.subr.bf16.mxu0 %v2943_v3 }
 0x2cf   : > { %2952 = vmatprep.subr.bf16.mxu1 %v2951_v4  ;;  %2946 = vmatpush1.bf16.msra.mxu0 %v2945_v60 }
 0x2d0   : > { %2954 = vmatpush1.bf16.msra.mxu1 %v2953_v63 }
 0x2d2   : > { %2869 = vmatmul.mubr.msk.f32.vlgmr.msra.gmra.mrb[16].mxu0 %vm837_vm1, %v1092_v5 }
 0x2d3   : > { %2873 = vmatmul.mubr.msk.f32.vlgmr.msra.gmra.mrb[16].mxu1 %vm837_vm1, %v1092_v5  ;;  %1202 = vmatprep.mubr.f32.mxu0 %v3269_v36 }
 0x2d4   : > { %1291 = vmatprep.mubr.f32.mxu1 %v3269_v36 }
 0x2d6   : > { %2870 = vmatmul.mubr.msk.f32.gmra.mrb[18].mxu0 %vm837_vm1, %v1093_v6 }
 0x2d7   : > { %2874 = vmatmul.mubr.msk.f32.gmra.mrb[18].mxu1 %vm837_vm1, %v1093_v6  ;;  %1208 = vmatprep.mubr.f32.mxu0 %v3269_v36 }
 0x2d8   : > { %1297 = vmatprep.mubr.f32.mxu1 %v3269_v36 }
 0x2da   : > { %2871 = vmatmul.mubr.msk.f32.gmra.mrb[20].mxu0 %vm837_vm1, %v1094_v7 }
 0x2db   : > { %2875 = vmatmul.mubr.msk.f32.gmra.mrb[20].mxu1 %vm837_vm1, %v1094_v7  ;;  %1214 = vmatprep.mubr.f32.mxu0 %v3269_v36 }
 0x2dc   : > { %1303 = vmatprep.mubr.f32.mxu1 %v3269_v36 }
 0x2de   : > { %2872 = vmatmul.mubr.msk.f32.gmra.mrb[22].mxu0 %vm837_vm1, %v1095_v8 }
 0x2df   : > { %2876 = vmatmul.mubr.msk.f32.gmra.mrb[22].mxu1 %vm837_vm1, %v1095_v8  ;;  %1448 = vmatprep.mubr.f32.mxu0 %v3269_v36 }
 0x2e0   : > { %1519 = vmatprep.mubr.f32.mxu1 %v3269_v36 }
 0x3a5   : > { %v1198_v10 = vpop.f32.mrb[16].mxu0 }
 0x3a6   : > { %v1199_v11 = vadd.f32 %v1198_v10, %v1103_v9  ;;  %v1287_v12 = vpop.f32.mrb[16].mxu1  ;;  %v1200_v13 = vpop.f32.mrb[17].mxu0 }
 0x3a7   : > { %v1288_v14 = vadd.f32 %v1287_v12, %v1103_v9  ;;  %v1201_v15 = vadd.f32 %v1200_v13, %v1103_v9  ;;  %v1289_v16 = vpop.f32.mrb[17].mxu1 }
 0x3a8   : > { %v1310_v17 = vmul.f32 0.5, %v1199_v11  ;;  %v1290_v20 = vadd.f32 %v1289_v16, %v1103_v9 }
 0x3a9   : > { %v1312_v22 = vmul.f32 0.5, %v1288_v14  ;;  %v1311_v23 = vmul.f32 0.5, %v1201_v15  ;;  %v1204_v24 = vpop.f32.mrb[18].mxu0 }
 0x3aa   : > { %3117 = vtanh.f32 %v1310_v17  ;;  %v1313_v25 = vmul.f32 0.5, %v1290_v20  ;;  %v1205_v26 = vadd.f32 %v1204_v24, %v1108_v21  ;;  %v1293_v27 = vpop.f32.mrb[18].mxu1  ;;  %v1206_v28 = vpop.f32.mrb[19].mxu0 }
 0x3ab   : > { %3119 = vtanh.f32 %v1312_v22  ;;  %v1294_v29 = vadd.f32 %v1293_v27, %v1108_v21  ;;  %v1207_v30 = vadd.f32 %v1206_v28, %v1108_v21  ;;  %v1295_v31 = vpop.f32.mrb[19].mxu1 }
 0x3ac   : > { %3121 = vtanh.f32 %v1311_v23  ;;  %v1314_v32 = vmul.f32 0.5, %v1205_v26  ;;  %v1296_v33 = vadd.f32 %v1295_v31, %v1108_v21 }
 0x3ad   : > { %3123 = vtanh.f32 %v1313_v25  ;;  %v1316_v35 = vmul.f32 0.5, %v1294_v29  ;;  %v1315_v37 = vmul.f32 0.5, %v1207_v30  ;;  %v1210_v38 = vpop.f32.mrb[20].mxu0 }
 0x3ae   : > { %3125 = vtanh.f32 %v1314_v32  ;;  %v1317_v39 = vmul.f32 0.5, %v1296_v33  ;;  %v1211_v40 = vadd.f32 %v1210_v38, %v1113_v34  ;;  %v1299_v41 = vpop.f32.mrb[20].mxu1  ;;  %v1212_v42 = vpop.f32.mrb[21].mxu0 }
 0x3af   : > { %3127 = vtanh.f32 %v1316_v35  ;;  %v1300_v43 = vadd.f32 %v1299_v41, %v1113_v34  ;;  %v1213_v44 = vadd.f32 %v1212_v42, %v1113_v34  ;;  %v1301_v45 = vpop.f32.mrb[21].mxu1 }
 0x3b0   : > { %3129 = vtanh.f32 %v1315_v37  ;;  %v1318_v46 = vmul.f32 0.5, %v1211_v40  ;;  %v1302_v47 = vadd.f32 %v1301_v45, %v1113_v34 }
 0x3b1   : > { %3131 = vtanh.f32 %v1317_v39  ;;  %v1320_v49 = vmul.f32 0.5, %v1300_v43  ;;  %v1319_v50 = vmul.f32 0.5, %v1213_v44  ;;  %v1216_v51 = vpop.f32.mrb[22].mxu0 }
 0x3b2   : > { %3133 = vtanh.f32 %v1318_v46  ;;  %v1321_v52 = vmul.f32 0.5, %v1302_v47  ;;  %v1217_v53 = vadd.f32 %v1216_v51, %v1118_v48  ;;  %v1305_v54 = vpop.f32.mrb[22].mxu1  ;;  %v1218_v55 = vpop.f32.mrb[23].mxu0 }
 0x3b3   : > { %3135 = vtanh.f32 %v1320_v49  ;;  %v1306_v56 = vadd.f32 %v1305_v54, %v1118_v48  ;;  %v1219_v57 = vadd.f32 %v1218_v55, %v1118_v48  ;;  %v1307_v58 = vpop.f32.mrb[23].mxu1 }
 0x3b4   : > { %v3118_v59 = vpop.eup %3117  ;;  %3137 = vtanh.f32 %v1319_v50  ;;  %v1322_v60 = vmul.f32 0.5, %v1217_v53  ;;  %v1308_v61 = vadd.f32 %v1307_v58, %v1118_v48 }
 0x3b5   : > { %v3120_v62 = vpop.eup %3119  ;;  %3139 = vtanh.f32 %v1321_v52  ;;  %v1324_v63 = vmul.f32 0.5, %v1306_v56  ;;  %v1323_v0 = vmul.f32 0.5, %v1219_v57  ;;  %v1342_v6 = vmul.f32 0.5, %v3118_v59 }
 0x3b6   : > { %v3122_v3 = vpop.eup %3121  ;;  %3141 = vtanh.f32 %v1322_v60  ;;  %v1325_v4 = vmul.f32 0.5, %v1308_v61  ;;  %v1344_v8 = vmul.f32 0.5, %v3120_v62  ;;  %v1374_v61 = vld [vmem:[%s4441_s7] sm:$0xf]  ;;  %v1550_v62 = vmul.f32 %v3499_v19, %v3499_v19 }
 0x3b7   : > { %v3124_v5 = vpop.eup %3123  ;;  %3143 = vtanh.f32 %v1324_v63  ;;  %v1343_v10 = vmul.f32 0.5, %v3122_v3  ;;  %v1358_v16 = vadd.f32 0.5, %v1342_v6  ;;  %v1552_v63 = vmul.f32 %v3497_v18, %v3497_v18 }
 0x3b8   : > { %v3126_v7 = vpop.eup %3125  ;;  %3145 = vtanh.f32 %v1323_v0  ;;  %v1345_v13 = vmul.f32 0.5, %v3124_v5  ;;  %v1360_v22 = vadd.f32 0.5, %v1344_v8  ;;  %v1551_v0 = vmul.f32 %v3451_v2, %v3451_v2 }
 0x3b9   : > { %v3128_v9 = vpop.eup %3127  ;;  %v1346_v11 = vmul.f32 0.5, %v3126_v7  ;;  %3147 = vtanh.f32 %v1325_v4  ;;  %v1359_v26 = vadd.f32 0.5, %v1343_v10  ;;  %v1558_v3 = vrot.slane %v1550_v62, 1 }
 0x3ba   : > { %v3130_v12 = vpop.eup %3129  ;;  %v1348_v14 = vmul.f32 0.5, %v3128_v9  ;;  %v1361_v30 = vadd.f32 0.5, %v1345_v13  ;;  %v1560_v4 = vrot.slane %v1552_v63, 1  ;;  %v1559_v5 = vrot.slane %v1551_v0, 1 }
 0x3bb   : > { %v3132_v15 = vpop.eup %3131  ;;  %v1362_v17 = vadd.f32 0.5, %v1346_v11  ;;  %v1347_v20 = vmul.f32 0.5, %v3130_v12  ;;  %v1566_v6 = vadd.f32 %v1558_v3, %v1550_v62  ;;  %v1608_v11 = vadd.f32 1.5707964, %v3497_v18 }
 0x3bc   : > { %v3134_v21 = vpop.eup %3133  ;;  %v1364_v23 = vadd.f32 0.5, %v1348_v14  ;;  %v1349_v24 = vmul.f32 0.5, %v3132_v15  ;;  %v1568_v7 = vadd.f32 %v1560_v4, %v1552_v63  ;;  %v3595_v8 = vadd.f32 %v1559_v5, %v1551_v0 }
 0x3bd   : > { %v3136_v25 = vpop.eup %3135  ;;  %v2957_v27 = vpack.c.bf16 %v1362_v17, %v1358_v16  ;;  %v1363_v28 = vadd.f32 0.5, %v1347_v20  ;;  %v1350_v34 = vmul.f32 0.5, %v3134_v21  ;;  %3149 = vrsqrt.f32 %v1566_v6 }
 0x3be   : > { %v3138_v29 = vpop.eup %3137  ;;  %v2965_v31 = vpack.c.bf16 %v1364_v23, %v1360_v22  ;;  %v1365_v32 = vadd.f32 0.5, %v1349_v24  ;;  %v1352_v38 = vmul.f32 0.5, %v3136_v25  ;;  %3151 = vrsqrt.f32 %v1568_v7  ;;  %v1379_v23 = vpop.permute.xlu1 %1378 }
 0x3bf   : > { %v3140_v33 = vpop.eup %3139  ;;  %v2955_v35 = vpack.c.bf16 %v1363_v28, %v1359_v26  ;;  %v1351_v41 = vmul.f32 0.5, %v3138_v29  ;;  %v1366_v47 = vadd.f32 0.5, %v1350_v34  ;;  %3153 = vrsqrt.f32 %v3595_v8 }
 0x3c0   : > { %v3142_v37 = vpop.eup %3141  ;;  %v2963_v39 = vpack.c.bf16 %v1365_v32, %v1361_v30  ;;  %v1353_v44 = vmul.f32 0.5, %v3140_v33  ;;  %v1368_v50 = vadd.f32 0.5, %v1352_v38  ;;  %v1606_v12 = vadd.f32 1.5707964, %v3499_v19 }
 0x3c1   : > { %v3144_v40 = vpop.eup %3143  ;;  %v1354_v42 = vmul.f32 0.5, %v3142_v37  ;;  %2956 = vmatprep.subr.bf16.mxu0 %v2955_v35  ;;  %v1367_v53 = vadd.f32 0.5, %v1351_v41  ;;  %v3601_v15 = vadd.f32 1.5707964, %v3451_v2  ;;  %v1631_v16 = vrot.slane %v3451_v2, 3 }
 0x3c2   : > { %v3146_v43 = vpop.eup %3145  ;;  %v1356_v45 = vmul.f32 0.5, %v3144_v40  ;;  %2964 = vmatprep.subr.bf16.mxu1 %v2963_v39  ;;  %2958 = vmatpush1.bf16.msra.mxu0 %v2957_v27  ;;  %v1369_v56 = vadd.f32 0.5, %v1353_v44  ;;  %v1620_v20 = vrot.slane %v1608_v11, 4  ;;  %v1618_v21 = vrot.slane %v1606_v12, 4 }
 0x3c3   : > { %v3148_v46 = vpop.eup %3147  ;;  %v1370_v48 = vadd.f32 0.5, %v1354_v42  ;;  %v1355_v49 = vmul.f32 0.5, %v3146_v43  ;;  %2966 = vmatpush1.bf16.msra.mxu1 %v2965_v31  ;;  %v1630_v22 = vrot.slane %v3499_v19, 3  ;;  %vm1572_vm3 = vcmp.eq.f32.partialorder %v1566_v6, inf }
 0x3c4   : > { %v1372_v51 = vadd.f32 0.5, %v1356_v45  ;;  %v1357_v52 = vmul.f32 0.5, %v3148_v46  ;;  %vm1574_vm4 = vcmp.eq.f32.partialorder %v1566_v6, 0.0  ;;  %v1575_v27 = vand.u32 2147483648, %v1566_v6 }
 0x3c5   : > { %v2961_v54 = vpack.c.bf16 %v1370_v48, %v1366_v47  ;;  %v1371_v55 = vadd.f32 0.5, %v1355_v49  ;;  %vm1586_vm5 = vcmp.eq.f32.partialorder %v1568_v7, inf  ;;  %v1589_v40 = vand.u32 2147483648, %v1568_v7 }
 0x3c6   : > { %v2969_v57 = vpack.c.bf16 %v1372_v51, %v1368_v50  ;;  %v1373_v58 = vadd.f32 0.5, %v1357_v52  ;;  %vm1588_vm6 = vcmp.eq.f32.partialorder %v1568_v7, 0.0  ;;  %v1632_v47 = vrot.slane %v3497_v18, 3 }
 0x3c7   : > { %v2959_v59 = vpack.c.bf16 %v1371_v55, %v1367_v53  ;;  %v3150_v9 = vpop.eup %3149  ;;  %v1663_v49 = vsel %vm1662_vm2, %v1618_v21, %v1630_v22  ;;  %vm1579_vm9 = vcmp.eq.f32.partialorder %v3595_v8, inf  ;;  %v1582_v62 = vand.u32 2147483648, %v3595_v8 }
 0x3c8   : > { %v2967_v60 = vpack.c.bf16 %v1373_v58, %v1369_v56  ;;  %v3152_v10 = vpop.eup %3151  ;;  %v1571_v14 = vmul.f32 %v3150_v9, %v1566_v6  ;;  %v1619_v56 = vrot.slane %v3601_v15, 4  ;;  %vm1581_vm10 = vcmp.eq.f32.partialorder %v3595_v8, 0.0 }
 0x3c9   : > { %2960 = vmatprep.subr.bf16.mxu0 %v2959_v59  ;;  %v3154_v13 = vpop.eup %3153  ;;  %v1585_v17 = vmul.f32 %v3152_v10, %v1568_v7 }
 0x3ca   : > { %2968 = vmatprep.subr.bf16.mxu1 %v2967_v60  ;;  %2962 = vmatpush1.bf16.msra.mxu0 %v2961_v54  ;;  %v1578_v25 = vmul.f32 %v3154_v13, %v3595_v8  ;;  %v1573_v30 = vsel %vm1572_vm3, %v1566_v6, %v1571_v14  ;;  %v1665_v54 = vsel %vm1662_vm2, %v1620_v20, %v1632_v47 }
 0x3cb   : > { %2970 = vmatpush1.bf16.msra.mxu1 %v2969_v57  ;;  %v1587_v37 = vsel %vm1586_vm5, %v1568_v7, %v1585_v17  ;;  %v3620_v43 = vsel %vm1574_vm4, %v1575_v27, %v1573_v30  ;;  %v3656_v11 = vsel %vm1662_vm2, %v1619_v56, %v1631_v16 }
 0x3cc   : > { %v3622_v45 = vsel %vm1588_vm6, %v1589_v40, %v1587_v37  ;;  %v2093_v51 = vmul.f32 0.05, %v3620_v43  ;;  %v1580_v3 = vsel %vm1579_vm9, %v3595_v8, %v1578_v25 }
 0x3cd   : > { %2877 = vmatmul.mubr.msk.f32.vlgmr.msra.gmra.mrb[24].mxu0 %vm837_vm1, %v1374_v61  ;;  %v2095_v55 = vmul.f32 0.05, %v3622_v45  ;;  %v3658_v8 = vsel %vm1581_vm10, %v1582_v62, %v1580_v3 }
 0x3ce   : > { %2878 = vmatmul.mubr.msk.f32.vlgmr.msra.gmra.mrb[24].mxu1 %vm837_vm1, %v1374_v61  ;;  %v3639_v63 = vadd.f32 0.01, %v2093_v51  ;;  %v3272_v51 = vmov 2475754826  }
 0x3cf   : > { %v3648_v6 = vadd.f32 0.01, %v2095_v55  ;;  %v3274_v55 = vmov 2102212464  }
 0x4a0   : > { %v1450_v24 = vpop.f32.mrb[24].mxu0 }
 0x4a1   : > { %v3606_v26 = vadd.f32 %v1450_v24, %v1379_v23  ;;  %v1521_v28 = vpop.f32.mrb[24].mxu1  ;;  %v1452_v29 = vpop.f32.mrb[25].mxu0 }
 0x4a2   : > { %v3608_v31 = vadd.f32 %v1521_v28, %v1379_v23  ;;  %v3610_v32 = vadd.f32 %v1452_v29, %v1379_v23  ;;  %v1523_v33 = vpop.f32.mrb[25].mxu1 }
 0x4a3   : > { %v1526_v34 = vmul.f32 0.5, %v3606_v26  ;;  %v2879_v35 = vclamps-f32 %v3606_v26, 1.3962634  ;;  %v3614_v38 = vadd.f32 %v1523_v33, %v1379_v23 }
 0x4a4   : > { %v1528_v39 = vmul.f32 0.5, %v3608_v31  ;;  %v2881_v41 = vclamps-f32 %v3608_v31, 1.3962634  ;;  %v1527_v42 = vmul.f32 0.5, %v3610_v32  ;;  %v2880_v10 = vclamps-f32 %v3610_v32, 1.3962634 }
 0x4a5   : > { %3155 = vtanh.f32 %v1526_v34  ;;  %v1610_v44 = vadd.f32 1.5707964, %v2879_v35  ;;  %v1654_v50 = vrot.slane %v2879_v35, 6 }
 0x4a6   : > { %3157 = vtanh.f32 %v1528_v39  ;;  %v1612_v46 = vadd.f32 1.5707964, %v2881_v41  ;;  %v1656_v58 = vrot.slane %v2881_v41, 6  ;;  %v3662_v16 = vadd.f32 1.5707964, %v2880_v10 }
 0x4a7   : > { %v1642_v48 = vrot.slane %v1610_v44, 7  ;;  %3159 = vtanh.f32 %v1527_v42  ;;  %v3665_v35 = vrot.slane %v2880_v10, 6 }
 0x4a8   : > { %v1644_v52 = vrot.slane %v1612_v46, 7  ;;  %v1643_v47 = vrot.slane %v3662_v16, 7 }
 0x4a9   : > { %v1668_v53 = vsel %vm1667_vm7, %v1663_v49, %v1642_v48  ;;  %v3271_v49 = vmov 683565275  }
 0x4aa   : > { %v3633_v57 = vsel %vm1672_vm8, %v1668_v53, %v1654_v50  ;;  %v1670_v59 = vsel %vm1667_vm7, %v1665_v54, %v1644_v52  ;;  %v3273_v53 = vmov 2131351028  }
 0x4ab   : > { %v1677_v60 = vand.u32 2147483647, %v3633_v57  ;;  %v1680_v61 = vand.u32 2139095040, %v3633_v57  ;;  %v3642_v0 = vsel %vm1672_vm8, %v1670_v59, %v1656_v58  ;;  %v3275_v58 = vmov 920167782  }
 0x4ac   : > { %v1885_v7 = vand.u32 2147483647, %v3642_v0  ;;  %v1888_v9 = vand.u32 2139095040, %v3642_v0 }
 0x4ad   : > { %v1681_v4 = vshrl.u32 %v1680_v61, 23  ;;  %v1684_v5 = vand.u32 8388607, %v1677_v60 }
 0x4ae   : > { %v1889_v17 = vshrl.u32 %v1888_v9, 23  ;;  %v1892_v20 = vand.u32 8388607, %v1885_v7  ;;  %v3276_v9 = vmov 1326507024  }
 0x4af   : > { %v3156_v12 = vpop.eup %3155  ;;  %v2883_v13 = vadd.s32 4294967169, %v1681_v4  ;;  %v1685_v21 = vor.u32 8388608, %v1684_v5 }
 0x4b0   : > { %v3158_v14 = vpop.eup %3157  ;;  %v1534_v15 = vmul.f32 0.5, %v3156_v12  ;;  %v2891_v27 = vadd.s32 4294967169, %v1889_v17  ;;  %v1893_v28 = vor.u32 8388608, %v1892_v20 }
 0x4b1   : > { %v1687_v22 = vadd.s32 1, %v2883_v13  ;;  %v1536_v23 = vmul.f32 0.5, %v3158_v14  ;;  %v3160_v24 = vpop.eup %3159  ;;  %v3667_v40 = vshll.u32 %v1685_v21, 8 }
 0x4b2   : > { %v1538_v25 = vadd.f32 0.5, %v1534_v15  ;;  %v1895_v34 = vadd.s32 1, %v2891_v27  ;;  %v1535_v41 = vmul.f32 0.5, %v3160_v24  ;;  %v3669_v46 = vshll.u32 %v1893_v28, 8 }
 0x4b3   : > { %vm1688_vm11 = vcmp.gt.s32.totalorder %v1687_v22, 0  ;;  %v1540_v29 = vadd.f32 0.5, %v1536_v23 }
 0x4b4   : > { %v1542_v30 = vmul.f32 9.9999, %v1538_v25  ;;  %v1689_v33 = vsel %vm1688_vm11, %v1687_v22, 0  ;;  %vm1896_vm12 = vcmp.gt.s32.totalorder %v1895_v34, 0  ;;  %vm1679_vm11 = vcmp.lt.s32.totalorder %v3633_v57, 0 }
 0x4b5   : > { %v1690_v37 = vshrl.u32 %v1689_v33, 5  ;;  %v1691_v39 = vand.u32 31, %v1689_v33  ;;  %v1544_v44 = vmul.f32 9.9999, %v1540_v29  ;;  %v1897_v21 = vsel %vm1896_vm12, %v1895_v34, 0 }
 0x4b6   : > { %v1546_v42 = vadd.f32 0.0001, %v1542_v30  ;;  %v3696_v29 = vshrl.u32 %v1897_v21, 5 }
 0x4b7   : > { %v1692_v48 = vsub.s32 32, %v1691_v39  ;;  %v1694_v50 = vshll.u32 %v3271_v49, %v1691_v39  ;;  %v1697_v52 = vshll.u32 %v3272_v51, %v1691_v39  ;;  %v1700_v54 = vshll.u32 %v3273_v53, %v1691_v39 }
 0x4b8   : > { %v1703_v56 = vshll.u32 %v3274_v55, %v1691_v39  ;;  %v1706_v59 = vshll.u32 %v3275_v58, %v1691_v39  ;;  %vm1709_vm13 = vcmp.lt.s32.totalorder %v1690_v37, 1  ;;  %vm1710_vm14 = vcmp.lt.s32.totalorder %v1690_v37, 2 }
 0x4b9   : > { %v1695_v61 = vshrl.u32 %v3272_v51, %v1692_v48  ;;  %v1698_v62 = vshrl.u32 %v3273_v53, %v1692_v48  ;;  %v1701_v3 = vshrl.u32 %v3274_v55, %v1692_v48  ;;  %v1693_v4 = vshrl.u32 %v3271_v49, %v1692_v48 }
 0x4ba   : > { %v1704_v5 = vshrl.u32 %v3275_v58, %v1692_v48  ;;  %v1707_v10 = vshrl.u32 %v3276_v9, %v1692_v48  ;;  %vm1711_vm15 = vcmp.lt.s32.totalorder %v1690_v37, 3  ;;  %v2757_v15 = vrot.slane %v1546_v42, 5 }
 0x4bb   : > { %v1696_v12 = vor.u32 %v1695_v61, %v1694_v50  ;;  %v1699_v13 = vor.u32 %v1698_v62, %v1697_v52  ;;  %v1702_v14 = vor.u32 %v1701_v3, %v1700_v54  ;;  %vm1712_vm0 = vcmp.lt.s32.totalorder %v1690_v37, 4 }
 0x4bc   : > { %v1705_v17 = vor.u32 %v1704_v5, %v1703_v56  ;;  %v1708_v20 = vor.u32 %v1707_v10, %v1706_v59  ;;  %2765 = vst [vmem:[%s3692_s17] sm:$0x60] %v2757_v15  ;;  %v1899_v39 = vand.u32 31, %v1897_v21  ;;  %v1539_v50 = vadd.f32 0.5, %v1535_v41 }
 0x4bd   : > { %v1713_v22 = vsel %vm1709_vm13, %v1693_v4, %v1696_v12  ;;  %v1714_v23 = vsel %vm1712_vm0, %v1702_v14, 2102212464  ;;  %v1717_v24 = vsel %vm1709_vm13, %v1696_v12, %v1699_v13  ;;  %v1721_v25 = vsel %vm1709_vm13, %v1699_v13, %v1702_v14 }
 0x4be   : > { %v1715_v27 = vsel %vm1711_vm15, %v1699_v13, %v1714_v23  ;;  %v1718_v28 = vsel %vm1712_vm0, %v1705_v17, 920167782  ;;  %v1722_v16 = vsel %vm1712_vm0, %v1708_v20, 1326507024  ;;  %v1669_v52 = vsel %vm1667_vm7, %v3656_v11, %v1643_v47 }
 0x4bf   : > { %v1716_v30 = vsel %vm1710_vm14, %v1713_v22, %v1715_v27  ;;  %v1719_v33 = vsel %vm1711_vm15, %v1702_v14, %v1718_v28  ;;  %v1723_v34 = vsel %vm1711_vm15, %v1705_v17, %v1722_v16  ;;  %v1548_v3 = vadd.f32 0.0001, %v1544_v44 }
 0x4c0   : > { %v1720_v42 = vsel %vm1710_vm14, %v1717_v24, %v1719_v33  ;;  %v1724_v48 = vsel %vm1710_vm14, %v1721_v25, %v1723_v34  ;;  %v1732_v62 = vmul.u32 %v3667_v40, %v1716_v30  ;;  %v1900_v4 = vsub.s32 32, %v1899_v39 }
 0x4c1   : > { %v3706_v54 = vmul.u32.u64.low %v3667_v40, %v1724_v48  ;;  %v3707_v56 = vmul.u32.u64.high %v3667_v40, %v1724_v48, %v3706_v54  ;;  %v3710_v59 = vmul.u32.u64.low %v3667_v40, %v1720_v42  ;;  %v3711_v61 = vmul.u32.u64.high %v3667_v40, %v1720_v42, %v3710_v59 }
 0x4c2   : > { %vm1917_vm1 = vcmp.lt.s32.totalorder %v3696_v29, 1  ;;  %v1902_v37 = vshll.u32 %v3271_v49, %v1899_v39  ;;  %v1905_v41 = vshll.u32 %v3272_v51, %v1899_v39  ;;  %v1908_v11 = vshll.u32 %v3273_v53, %v1899_v39 }
 0x4c3   : > { %v1911_v47 = vshll.u32 %v3274_v55, %v1899_v39  ;;  %v1903_v5 = vshrl.u32 %v3272_v51, %v1900_v4  ;;  %v1906_v10 = vshrl.u32 %v3273_v53, %v1900_v4  ;;  %v1909_v12 = vshrl.u32 %v3274_v55, %v1900_v4 }
 0x4c4   : > { %v1914_v40 = vshll.u32 %v3275_v58, %v1899_v39  ;;  %vm1734_vm3 = vc.u32 %v3707_v56, %v3710_v59  ;;  %v1735_v44 = vadd.s32 1, %v3711_v61  ;;  %v1912_v13 = vshrl.u32 %v3275_v58, %v1900_v4 }
 0x4c5   : > { %vm1918_vm4 = vcmp.lt.s32.totalorder %v3696_v29, 2  ;;  %v1904_v14 = vor.u32 %v1903_v5, %v1902_v37  ;;  %v1907_v15 = vor.u32 %v1906_v10, %v1905_v41  ;;  %v1910_v17 = vor.u32 %v1909_v12, %v1908_v11 }
 0x4c6   : > { %v1915_v20 = vshrl.u32 %v3276_v9, %v1900_v4  ;;  %v1736_v21 = vsel %vm1734_vm3, %v1735_v44, %v3711_v61  ;;  %v1913_v22 = vor.u32 %v1912_v13, %v1911_v47  ;;  %vm1920_vm5 = vcmp.lt.s32.totalorder %v3696_v29, 4 }
 0x4c7   : > { %v2759_v23 = vrot.slane %v1548_v3, 5  ;;  %v1737_v24 = vadd.s32 %v1736_v21, %v1732_v62  ;;  %v1901_v25 = vshrl.u32 %v3271_v49, %v1900_v4  ;;  %v1922_v28 = vsel %vm1920_vm5, %v1910_v17, 2102212464 }
 0x4c8   : > { %v1916_v27 = vor.u32 %v1915_v20, %v1914_v40  ;;  %vm1919_vm6 = vcmp.lt.s32.totalorder %v3696_v29, 3  ;;  %v1925_v16 = vsel %vm1917_vm1, %v1904_v14, %v1907_v15  ;;  %v1926_v30 = vsel %vm1920_vm5, %v1913_v22, 920167782 }
 0x4c9   : > { %v1929_v33 = vsel %vm1917_vm1, %v1907_v15, %v1910_v17  ;;  %2767 = vst [vmem:[%s3692_s17 + $0x10] sm:$0x60] %v2759_v23  ;;  %v1738_v34 = vadd.s32 536870912, %v1737_v24  ;;  %v1921_v39 = vsel %vm1917_vm1, %v1901_v25, %v1904_v14  ;;  %v1927_v42 = vsel %vm1919_vm6, %v1910_v17, %v1926_v30 }
 0x4ca   : > { %v1930_v48 = vsel %vm1920_vm5, %v1916_v27, 1326507024  ;;  %v1923_v54 = vsel %vm1919_vm6, %v1907_v15, %v1922_v28  ;;  %v1928_v61 = vsel %vm1918_vm4, %v1925_v16, %v1927_v42  ;;  %v1543_v3 = vmul.f32 9.9999, %v1539_v50 }
 0x4cb   : > { %v1931_v62 = vsel %vm1919_vm6, %v1913_v22, %v1930_v48  ;;  %v3743_v4 = vshrl.u32 %v1738_v34, 30  ;;  %v3748_v41 = vmul.u32.u64.low %v3669_v46, %v1928_v61  ;;  %v3749_v11 = vmul.u32.u64.high %v3669_v46, %v1928_v61, %v3748_v41 }
 0x4cc   : > { %v1932_v37 = vsel %vm1918_vm4, %v1929_v33, %v1931_v62  ;;  %v1547_v10 = vadd.f32 0.0001, %v1543_v3  ;;  %v3758_v12 = vsel %vm1672_vm8, %v1669_v52, %v3665_v35  ;;  %v1553_v50 = vmul.f32 %v3449_v1, %v3449_v1 }
 0x4cd   : > { %v3753_v47 = vmul.u32.u64.low %v3669_v46, %v1932_v37  ;;  %v3754_v5 = vmul.u32.u64.high %v3669_v46, %v1932_v37, %v3753_v47  ;;  %v1609_v40 = vadd.f32 1.5707964, %v3449_v1  ;;  %v1740_v44 = vshll.u32 %v3743_v4, 30 }
 0x4ce   : > { %v1924_v13 = vsel %vm1918_vm4, %v1921_v39, %v1923_v54  ;;  %v2101_v14 = vmul.f32 %v3639_v63, %v3620_v43  ;;  %v1784_v15 = vand.u32 2139095040, %v3758_v12  ;;  %v2094_v17 = vmul.f32 0.05, %v3658_v8 }
 0x4cf   : > { %v2758_v35 = vrot.slane %v1547_v10, 5  ;;  %v3770_v52 = vsub.s32 %v1737_v24, %v1740_v44  ;;  %v2145_v20 = vlaneseq  ;;  %v1943_v21 = vadd.s32 1, %v3749_v11 }
 0x4d0   : > { %v2103_v22 = vmul.f32 %v3648_v6, %v3622_v45  ;;  %v1940_v23 = vmul.u32 %v3669_v46, %v1924_v13  ;;  %vm1942_vm9 = vc.u32 %v3754_v5, %v3748_v41  ;;  %v1781_v63 = vand.u32 2147483647, %v3758_v12 }
 0x4d1   : > { %v1785_v29 = vshrl.u32 %v1784_v15, 23  ;;  %2766 = vst [vmem:[%s3692_s17 + $0x8] sm:$0x60] %v2758_v35  ;;  %v1561_v25 = vrot.slane %v1553_v50, 1  ;;  %v1633_v27 = vrot.slane %v3449_v1, 3  ;;  %v1743_v24 = vsub.s32 0, %v3770_v52 }
 0x4d2   : > { %v1944_v28 = vsel %vm1942_vm9, %v1943_v21, %v3749_v11  ;;  %v1621_v16 = vrot.slane %v1609_v40, 4  ;;  %v2098_v6 = vadd.f32 0.01, %v2094_v17  ;;  %v2109_v34 = vrot.slane %v2101_v14, 2 }
 0x4d3   : > { %v1945_v30 = vadd.s32 %v1944_v28, %v1940_v23  ;;  %v2887_v33 = vadd.s32 4294967169, %v1785_v29  ;;  %v2884_v46 = vmin.u32 %v1743_v24, %v3770_v52  ;;  %v3785_v39 = vshrl.u32 %v2145_v20, 7 }
 0x4d4   : > { %v2111_v42 = vrot.slane %v2103_v22, 2  ;;  %v1788_v54 = vand.u32 8388607, %v1781_v63  ;;  %v3789_v62 = vadd.f32 %v1561_v25, %v1553_v50  ;;  %v2117_v37 = vsub.f32 %v3606_v26, %v2109_v34 }
 0x4d5   : > { %v1946_v48 = vadd.s32 536870912, %v1945_v30  ;;  %v1791_v61 = vadd.s32 1, %v2887_v33  ;;  %v1745_v3 = vclz %v2884_v46  ;;  %v3796_v10 = vmul.f32 %v2098_v6, %v3658_v8 }
 0x4d6   : > { %v2119_v11 = vsub.f32 %v3608_v31, %v2111_v42  ;;  %v3799_v40 = vsel %vm1662_vm2, %v1621_v16, %v1633_v27  ;;  %v1763_v13 = vsub.s32 4, %v3743_v4  ;;  %v3803_v50 = vsub.s32 2, %v3785_v39 }
 0x4d7   : > { %v3793_v47 = vshrl.u32 %v1946_v48, 30  ;;  %vm1792_vm10 = vcmp.gt.s32.totalorder %v1791_v61, 0  ;;  %v2885_v44 = vadd.s32 4294967294, %v1745_v3  ;;  %v1789_v15 = vor.u32 8388608, %v1788_v54 }
 0x4d8   : > { %v1793_v14 = vsel %vm1792_vm10, %v1791_v61, 0  ;;  %v1529_v17 = vmul.f32 0.5, %v3614_v38  ;;  %v3808_v35 = vmul.f32 0.1, %v2117_v37  ;;  %v3810_v21 = vmul.f32 0.1, %v2119_v11 }
 0x4d9   : > { %v1948_v26 = vshll.u32 %v3793_v47, 30  ;;  %v1795_v31 = vand.u32 31, %v1793_v14  ;;  %vm2886_vm12 = vcmp.lt.s32.totalorder %v2885_v44, 0  ;;  %v1733_v22 = vadd.s32 %v3710_v59, %v3707_v56 }
 0x4da   : > { %v1748_v23 = vsel %vm2886_vm12, 0, %v2885_v44  ;;  %v3819_v28 = vsel %vm1679_vm11, %v1763_v13, %v3743_v4  ;;  %v1941_v16 = vadd.s32 %v3748_v41, %v3754_v5  ;;  %v3824_v6 = vshll.u32 %v1789_v15, 8 }
 0x4db   : > { %v3814_v29 = vsub.s32 %v1945_v30, %v1948_v26  ;;  %v1796_v25 = vsub.s32 32, %v1795_v31  ;;  %v1749_v27 = vsub.s32 32, %v1748_v23  ;;  %v1753_v24 = vsub.s32 4294967266, %v1748_v23 }
 0x4dc   : > { %3161 = vtanh.f32 %v1529_v17  ;;  %v2882_v56 = vclamps-f32 %v3614_v38, 1.3962634  ;;  %v1750_v59 = vshll.u32 %v3770_v52, %v1748_v23  ;;  %v3830_v4 = vshrl.u32 %v1793_v14, 5 }
 0x4dd   : > { %v1951_v33 = vsub.s32 0, %v3814_v29  ;;  %v1751_v30 = vshrl.u32 %v1733_v22, %v1749_v27  ;;  %v1754_v46 = vadd.s32 127, %v1753_v24  ;;  %v1799_v34 = vshrl.u32 %v3272_v51, %v1796_v25 }
 0x4de   : > { %v1798_v48 = vshll.u32 %v3271_v49, %v1795_v31  ;;  %v1802_v41 = vshrl.u32 %v3273_v53, %v1796_v25  ;;  %v1801_v61 = vshll.u32 %v3272_v51, %v1795_v31  ;;  %v1805_v3 = vshrl.u32 %v3274_v55, %v1796_v25 }
 0x4df   : > { %v2892_v42 = vmin.u32 %v1951_v33, %v3814_v29  ;;  %v1752_v5 = vor.u32 %v1751_v30, %v1750_v59  ;;  %v1755_v54 = vshll.u32 %v1754_v46, 23  ;;  %v1797_v52 = vshrl.u32 %v3271_v49, %v1796_v25 }
 0x4e0   : > { %v1804_v11 = vshll.u32 %v3273_v53, %v1795_v31  ;;  %v3840_v44 = vadd.f32 1.5707964, %v2882_v56  ;;  %vm3844_vm13 = vcmp.le.f32.partialorder %v1677_v60, 0.7853982  ;;  %v1800_v15 = vor.u32 %v1799_v34, %v1798_v48 }
 0x4e1   : > { %v1953_v37 = vclz %v2892_v42  ;;  %v1756_v14 = vor.u32 4788187, %v1755_v54  ;;  %v1759_v26 = vcvt.s32.f32 %v1752_v5  ;;  %v1803_v17 = vor.u32 %v1802_v41, %v1801_v61 }
 0x4e2   : > { %v1806_v23 = vor.u32 %v1805_v3, %v1804_v11  ;;  %v1807_v27 = vshll.u32 %v3274_v55, %v1795_v31  ;;  %v1808_v24 = vshrl.u32 %v3275_v58, %v1796_v25  ;;  %v1810_v59 = vshll.u32 %v3275_v58, %v1795_v31 }
 0x4e3   : > { %v2893_v22 = vadd.s32 4294967294, %v1953_v37  ;;  %v1757_v33 = vand.u32 2147483647, %v1756_v14  ;;  %v1811_v30 = vshrl.u32 %v3276_v9, %v1796_v25  ;;  %vm1813_vm14 = vcmp.lt.s32.totalorder %v3830_v4, 1 }
 0x4e4   : > { %v1809_v60 = vor.u32 %v1808_v24, %v1807_v27  ;;  %vm1814_vm0 = vcmp.lt.s32.totalorder %v3830_v4, 2  ;;  %vm1815_vm1 = vcmp.lt.s32.totalorder %v3830_v4, 3  ;;  %vm1816_vm3 = vcmp.lt.s32.totalorder %v3830_v4, 4 }
 0x4e5   : > { %vm2894_vm15 = vcmp.lt.s32.totalorder %v2893_v22, 0  ;;  %v1760_v46 = vmul.f32 %v1759_v26, %v1757_v33  ;;  %v1812_v42 = vor.u32 %v1811_v30, %v1810_v59  ;;  %v1817_v31 = vsel %vm1813_vm14, %v1797_v52, %v1800_v15 }
 0x4e6   : > { %v1956_v34 = vsel %vm2894_vm15, 0, %v2893_v22  ;;  %v3162_v48 = vpop.eup %3161  ;;  %v1818_v25 = vsel %vm1816_vm3, %v1806_v23, 2102212464  ;;  %v1821_v3 = vsel %vm1813_vm14, %v1800_v15, %v1803_v17  ;;  %v1822_v37 = vsel %vm1816_vm3, %v1809_v60, 920167782 }
 0x4e7   : > { %v1957_v41 = vsub.s32 32, %v1956_v34  ;;  %v1961_v5 = vsub.s32 4294967266, %v1956_v34  ;;  %v1761_v54 = vxor.u32 2147483648, %v1760_v46  ;;  %v1958_v61 = vshll.u32 %v3814_v29, %v1956_v34 }
 0x4e8   : > { %v1819_v26 = vsel %vm1815_vm1, %v1803_v17, %v1818_v25  ;;  %v1823_v52 = vsel %vm1815_vm1, %v1806_v23, %v1822_v37  ;;  %v1825_v15 = vsel %vm1813_vm14, %v1803_v17, %v1806_v23  ;;  %v1826_v27 = vsel %vm1816_vm3, %v1812_v42, 1326507024 }
 0x4e9   : > { %v1959_v11 = vshrl.u32 %v1941_v16, %v1957_v41  ;;  %v1962_v14 = vadd.s32 127, %v1961_v5  ;;  %v1762_v22 = vsel %vm1679_vm11, %v1761_v54, %v1760_v46  ;;  %v1824_v29 = vsel %vm1814_vm0, %v1821_v3, %v1823_v52 }
 0x4ea   : > { %v1765_v16 = vsel %vm3844_vm13, %v3633_v57, %v1762_v22  ;;  %v1827_v59 = vsel %vm1815_vm1, %v1809_v60, %v1826_v27  ;;  %v3885_v46 = vmul.u32.u64.low %v3824_v6, %v1824_v29  ;;  %v3886_v34 = vmul.u32.u64.high %v3824_v6, %v1824_v29, %v3885_v46 }
 0x4eb   : > { %v1960_v24 = vor.u32 %v1959_v11, %v1958_v61  ;;  %v1963_v33 = vshll.u32 %v1962_v14, 23  ;;  %3163 = vcosq.f32 %v1765_v16  ;;  %v1828_v30 = vsel %vm1814_vm0, %v1825_v15, %v1827_v59 }
 0x4ec   : > { %v1766_v17 = vsel %vm3844_vm13, 0, %v3819_v28  ;;  %3165 = vsinq.f32 %v1765_v16  ;;  %v2129_v23 = vrot.slane %v3808_v35, 6  ;;  %v1971_v41 = vsub.s32 4, %v3793_v47 }
 0x4ed   : > { %v1964_v42 = vor.u32 4788187, %v1963_v33  ;;  %v3895_v60 = vmul.u32.u64.low %v3824_v6, %v1828_v30  ;;  %v3896_v5 = vmul.u32.u64.high %v3824_v6, %v1828_v30, %v3895_v60  ;;  %v1537_v25 = vmul.f32 0.5, %v3162_v48 }
 0x4ee   : > { %v1967_v61 = vcvt.s32.f32 %v1960_v24  ;;  %v1820_v3 = vsel %vm1814_vm0, %v1817_v31, %v1819_v26  ;;  %v1645_v37 = vrot.slane %v3840_v44, 7  ;;  %v1770_v13 = vadd.s32 3, %v1766_v17 }
 0x4ef   : > { %v1965_v54 = vand.u32 2147483647, %v1964_v42  ;;  %v2131_v28 = vrot.slane %v3810_v21, 6  ;;  %v1839_v35 = vadd.s32 1, %v3886_v34  ;;  %v1541_v11 = vadd.f32 0.5, %v1537_v25 }
 0x4f0   : > { %v3904_v14 = vadd.f32 %v2129_v23, %v3620_v43  ;;  %v1657_v48 = vrot.slane %v2882_v56, 6  ;;  %v1671_v22 = vsel %vm1667_vm7, %v3799_v40, %v1645_v37  ;;  %vm1887_vm4 = vcmp.lt.s32.totalorder %v3642_v0, 0 }
 0x4f1   : > { %v1968_v52 = vmul.f32 %v1967_v61, %v1965_v54  ;;  %v1836_v4 = vmul.u32 %v3824_v6, %v1820_v3  ;;  %vm1838_vm5 = vc.u32 %v3896_v5, %v3885_v46  ;;  %v1545_v21 = vmul.f32 9.9999, %v1541_v11 }
 0x4f2   : > { %v1972_v31 = vsel %vm1887_vm4, %v1971_v41, %v3793_v47  ;;  %v1840_v43 = vsel %vm1838_vm5, %v1839_v35, %v3886_v34  ;;  %v3917_v26 = vsel %vm1672_vm8, %v1671_v22, %v1657_v48  ;;  %vm1769_vm6 = vweird.f32 %v3633_v57 }
 0x4f3   : > { %v1969_v44 = vxor.u32 2147483648, %v1968_v52  ;;  %v1771_v56 = vand.u32 3, %v1770_v13  ;;  %v3921_v40 = vadd.f32 %v2131_v28, %v3622_v45  ;;  %v1841_v29 = vadd.s32 %v1840_v43, %v1836_v4 }
 0x4f4   : > { %v2141_v6 = vmul.f32 0.1, %v3904_v14  ;;  %vm3926_vm7 = vcmp.le.f32.partialorder %v1885_v7, 0.7853982  ;;  %v1992_v27 = vand.u32 2139095040, %v3917_v26  ;;  %v2110_v43 = vrot.slane %v3796_v10, 2 }
 0x4f5   : > { %v1970_v47 = vsel %vm1887_vm4, %v1969_v44, %v1968_v52  ;;  %v3164_v16 = vpop.eup %3163  ;;  %v1974_v45 = vsel %vm3926_vm7, 0, %v1972_v31  ;;  %v1842_v33 = vadd.s32 536870912, %v1841_v29  ;;  %v1549_v59 = vadd.f32 0.0001, %v1545_v21 }
 0x4f6   : > { %v1973_v24 = vsel %vm3926_vm7, %v3642_v0, %v1970_v47  ;;  %v3166_v30 = vpop.eup %3165  ;;  %v1777_v34 = vxor.u32 2147483648, %v3164_v16  ;;  %v1989_v7 = vand.u32 2147483647, %v3917_v26  ;;  %v1993_v17 = vshrl.u32 %v1992_v27, 23 }
 0x4f7   : > { %3167 = vcosq.f32 %v1973_v24  ;;  %v1774_v23 = vxor.u32 2147483648, %v3166_v30  ;;  %vm1776_vm8 = vcmp.eq.s32.totalorder %v1771_v56, 2  ;;  %v3937_v42 = vshrl.u32 %v1842_v33, 30 }
 0x4f8   : > { %3169 = vsinq.f32 %v1973_v24  ;;  %vm1773_vm9 = vcmp.eq.s32.totalorder %v1771_v56, 0  ;;  %v1778_v41 = vsel %vm1776_vm8, %v1777_v34, %v3166_v30  ;;  %v1978_v60 = vadd.s32 3, %v1974_v45 }
 0x4f9   : > { %v2895_v25 = vadd.s32 4294967169, %v1993_v17  ;;  %vm1772_vm10 = vcmp.lt.s32.totalorder %v1771_v56, 2  ;;  %v1775_v54 = vsel %vm1773_vm9, %v3164_v16, %v1774_v23  ;;  %v2148_v61 = vrot.slane %v2141_v6, %v3803_v50 }
 0x4fa   : > { %v1844_v3 = vshll.u32 %v3937_v42, 30  ;;  %v1779_v37 = vsel %vm1772_vm10, %v1775_v54, %v1778_v41  ;;  %v1996_v13 = vand.u32 8388607, %v1989_v7  ;;  %v2760_v35 = vrot.slane %v1549_v59, 5 }
 0x4fb   : > { %v1999_v28 = vadd.s32 1, %v2895_v25  ;;  %v1780_v11 = vsel %vm1769_vm6, nan, %v1779_v37  ;;  %v2169_v52 = vmul.f32 0.033783782, %v3904_v14  ;;  %v2143_v48 = vmul.f32 0.1, %v3921_v40 }
 0x4fc   : > { %v3947_v22 = vsub.s32 %v1841_v29, %v1844_v3  ;;  %v2161_v4 = vmul.f32 %v2148_v61, %v1780_v11  ;;  %v2177_v21 = vrot.slane %v1780_v11, 1  ;;  %3171 = vrcp.f32 %v1780_v11  ;;  %2768 = vst [vmem:[%s3692_s17 + $0x18] sm:$0x60] %v2760_v35 }
 0x4fd   : > { %v1979_v44 = vand.u32 3, %v1978_v60  ;;  %vm2000_vm11 = vcmp.gt.s32.totalorder %v1999_v28, 0  ;;  %v1997_v6 = vor.u32 8388608, %v1996_v13  ;;  %v3955_v29 = vsub.f32 %v3610_v32, %v2110_v43 }
 0x4fe   : > { %v1847_v31 = vsub.s32 0, %v3947_v22  ;;  %v2165_v57 = vadd.f32 %v2161_v4, %v3499_v19  ;;  %v2185_v56 = vmul.f32 %v2177_v21, %v2169_v52  ;;  %v2001_v15 = vsel %vm2000_vm11, %v1999_v28, 0 }
 0x4ff   : > { %3173 = vrsqrt.f32 %v3789_v62  ;;  %v2003_v27 = vand.u32 31, %v2001_v15  ;;  %vm1977_vm12 = vweird.f32 %v3642_v0  ;;  %vm1980_vm13 = vcmp.lt.s32.totalorder %v1979_v44, 2 }
 0x500   : > { %v2888_v47 = vmin.u32 %v1847_v31, %v3947_v22  ;;  %2681 = vst [vmem:[%s3692_s17] sm:$0x3] %v2165_v57  ;;  %v2156_v10 = vrot.slane %v2143_v48, %v3803_v50  ;;  %v2171_v24 = vmul.f32 0.033783782, %v3921_v40  ;;  %vm1981_vm14 = vcmp.eq.s32.totalorder %v1979_v44, 0 }
 0x501   : > { %v3168_v16 = vpop.eup %3167  ;;  %vm1984_vm15 = vcmp.eq.s32.totalorder %v1979_v44, 2  ;;  %v1837_v32 = vadd.s32 %v3885_v46, %v3896_v5  ;;  %v2004_v34 = vsub.s32 32, %v2003_v27  ;;  %v3964_v17 = vshll.u32 %v1997_v6, 8 }
 0x502   : > { %v3170_v45 = vpop.eup %3169  ;;  %v1985_v33 = vxor.u32 2147483648, %v3168_v16  ;;  %v1849_v59 = vclz %v2888_v47  ;;  %v3966_v60 = vshrl.u32 %v2001_v15, 5  ;;  %v2006_v25 = vshll.u32 %v3271_v49, %v2003_v27 }
 0x503   : > { %v1982_v30 = vxor.u32 2147483648, %v3170_v45  ;;  %v2007_v61 = vshrl.u32 %v3272_v51, %v2004_v34  ;;  %v2009_v3 = vshll.u32 %v3272_v51, %v2003_v27  ;;  %v2010_v37 = vshrl.u32 %v3273_v53, %v2004_v34 }
 0x504   : > { %v1986_v23 = vsel %vm1984_vm15, %v1985_v33, %v3170_v45  ;;  %v2889_v41 = vadd.s32 4294967294, %v1849_v59  ;;  %v2005_v46 = vshrl.u32 %v3271_v49, %v2004_v34  ;;  %v2012_v5 = vshll.u32 %v3273_v53, %v2003_v27 }
 0x505   : > { %v1983_v54 = vsel %vm1981_vm14, %v3168_v16, %v1982_v30  ;;  %v2013_v52 = vshrl.u32 %v3274_v55, %v2004_v34  ;;  %v2015_v48 = vshll.u32 %v3274_v55, %v2003_v27  ;;  %v2008_v57 = vor.u32 %v2007_v61, %v2006_v25 }
 0x506   : > { %v1987_v13 = vsel %vm1980_vm13, %v1983_v54, %v1986_v23  ;;  %vm2890_vm0 = vcmp.lt.s32.totalorder %v2889_v41, 0  ;;  %v3172_v28 = vpop.eup %3171  ;;  %v2011_v6 = vor.u32 %v2010_v37, %v2009_v3  ;;  %v2016_v45 = vshrl.u32 %v3275_v58, %v2004_v34 }
 0x507   : > { %v1988_v35 = vsel %vm1977_vm12, nan, %v1987_v13  ;;  %v1852_v11 = vsel %vm2890_vm0, 0, %v2889_v41  ;;  %v2193_v4 = vmul.f32 %v3172_v28, %v2185_v56  ;;  %v2018_v56 = vshll.u32 %v3275_v58, %v2003_v27 }
 0x508   : > { %v2163_v21 = vmul.f32 %v2156_v10, %v1988_v35  ;;  %v2179_v31 = vrot.slane %v1988_v35, 1  ;;  %3175 = vrcp.f32 %v1988_v35  ;;  %v1853_v44 = vsub.s32 32, %v1852_v11 }
 0x509   : > { %v1857_v43 = vsub.s32 4294967266, %v1852_v11  ;;  %v3979_v15 = vpop.eup %3173  ;;  %v2201_v47 = vrot.slane %v2193_v4, 6  ;;  %v1854_v16 = vshll.u32 %v3947_v22, %v1852_v11  ;;  %v2019_v10 = vshrl.u32 %v3276_v9, %v2004_v34 }
 0x50a   : > { %v2167_v0 = vadd.f32 %v2163_v21, %v3497_v18  ;;  %v1855_v33 = vshrl.u32 %v1837_v32, %v1853_v44  ;;  %v2187_v23 = vmul.f32 %v2179_v31, %v2171_v24  ;;  %v2014_v41 = vor.u32 %v2013_v52, %v2012_v5 }
 0x50b   : > { %v1858_v59 = vadd.s32 127, %v1857_v43  ;;  %v2209_v30 = vadd.f32 %v2201_v47, %v3499_v19  ;;  %v2017_v25 = vor.u32 %v2016_v45, %v2015_v48  ;;  %v2020_v3 = vor.u32 %v2019_v10, %v2018_v56 }
 0x50c   : > { %2683 = vst [vmem:[%s3692_s17 + $0x10] sm:$0x3] %v2167_v0  ;;  %v1856_v54 = vor.u32 %v1855_v33, %v1854_v16  ;;  %vm2021_vm1 = vcmp.lt.s32.totalorder %v3966_v60, 1  ;;  %vm2022_vm3 = vcmp.lt.s32.totalorder %v3966_v60, 2  ;;  %vm2024_vm4 = vcmp.lt.s32.totalorder %v3966_v60, 4 }
 0x50d   : > { %v1859_v61 = vshll.u32 %v1858_v59, 23  ;;  %v2213_v22 = vadd.f32 3.1415927, %v2209_v30  ;;  %v2029_v32 = vsel %vm2021_vm1, %v2008_v57, %v2011_v6  ;;  %vm2023_vm5 = vcmp.lt.s32.totalorder %v3966_v60, 3 }
 0x50e   : > { %v2025_v34 = vsel %vm2021_vm1, %v2005_v46, %v2008_v57  ;;  %v2030_v19 = vsel %vm2024_vm4, %v2017_v25, 920167782  ;;  %v2026_v37 = vsel %vm2024_vm4, %v2014_v41, 2102212464  ;;  %v2033_v5 = vsel %vm2021_vm1, %v2011_v6, %v2014_v41 }
 0x50f   : > { %v1860_v27 = vor.u32 4788187, %v1859_v61  ;;  %v2217_v24 = vmul.f32 0.15915494, %v2213_v22  ;;  %v2031_v13 = vsel %vm2023_vm5, %v2014_v41, %v2030_v19  ;;  %v1863_v35 = vcvt.s32.f32 %v1856_v54 }
 0x510   : > { %v2032_v11 = vsel %vm2022_vm3, %v2029_v32, %v2031_v13  ;;  %v2034_v52 = vsel %vm2024_vm4, %v2020_v3, 1326507024  ;;  %v2027_v57 = vsel %vm2023_vm5, %v2011_v6, %v2026_v37  ;;  %v1867_v16 = vsub.s32 4, %v3937_v42 }
 0x511   : > { %v1861_v28 = vand.u32 2147483647, %v1860_v27  ;;  %v2221_v4 = vfloor.f32 %v2217_v24  ;;  %v2035_v21 = vsel %vm2023_vm5, %v2017_v25, %v2034_v52  ;;  %vm1783_vm6 = vcmp.lt.s32.totalorder %v3758_v12, 0 }
 0x512   : > { %v3176_v48 = vpop.eup %3175  ;;  %v3999_v46 = vmul.u32.u64.low %v3964_v17, %v2032_v11  ;;  %v4000_v31 = vmul.u32.u64.high %v3964_v17, %v2032_v11, %v3999_v46  ;;  %v2036_v47 = vsel %vm2022_vm3, %v2033_v5, %v2035_v21  ;;  %vm4021_vm7 = vcmp.le.f32.partialorder %v1781_v63, 0.7853982 }
 0x513   : > { %v2195_v44 = vmul.f32 %v3176_v48, %v2187_v23  ;;  %v1864_v43 = vmul.f32 %v1863_v35, %v1861_v28  ;;  %v2225_v0 = vmul.f32 6.2831855, %v2221_v4  ;;  %v2028_v23 = vsel %vm2022_vm3, %v2025_v34, %v2027_v57 }
 0x514   : > { %v4009_v45 = vmul.u32.u64.low %v3964_v17, %v2036_v47  ;;  %v4010_v33 = vmul.u32.u64.high %v3964_v17, %v2036_v47, %v4009_v45  ;;  %v2047_v6 = vadd.s32 1, %v4000_v31  ;;  %v2122_v3 = vmul.f32 0.1, %v3955_v29 }
 0x515   : > { %v2203_v59 = vrot.slane %v2195_v44, 6  ;;  %v1865_v56 = vxor.u32 2147483648, %v1864_v43  ;;  %v4012_v10 = vsub.f32 %v2209_v30, %v2225_v0  ;;  %v1868_v30 = vsel %vm1783_vm6, %v1867_v16, %v3937_v42 }
 0x516   : > { %vm2046_vm8 = vc.u32 %v4010_v33, %v3999_v46  ;;  %v1870_v34 = vsel %vm4021_vm7, 0, %v1868_v30  ;;  %v2130_v24 = vrot.slane %v2122_v3, 6  ;;  %v1592_v13 = vmul.f32 %v3979_v15, %v3789_v62 }
 0x517   : > { %v2211_v41 = vadd.f32 %v2203_v59, %v3497_v18  ;;  %v1866_v54 = vsel %vm1783_vm6, %v1865_v56, %v1864_v43  ;;  %v2233_v61 = vadd.f32 1.5707964, %v4012_v10  ;;  %v2044_v18 = vmul.u32 %v3964_v17, %v2028_v23 }
 0x518   : > { %v1869_v60 = vsel %vm4021_vm7, %v3758_v12, %v1866_v54  ;;  %v2253_v32 = vrot.slane %v4012_v10, 3  ;;  %v2048_v27 = vsel %vm2046_vm8, %v2047_v6, %v4000_v31  ;;  %v1874_v28 = vadd.s32 3, %v1870_v34 }
 0x519   : > { %v2215_v22 = vadd.f32 3.1415927, %v2211_v41  ;;  %3177 = vcosq.f32 %v1869_v60  ;;  %v2241_v63 = vrot.slane %v2233_v61, 4  ;;  %v2049_v19 = vadd.s32 %v2048_v27, %v2044_v18 }
 0x51a   : > { %3179 = vsinq.f32 %v1869_v60  ;;  %vm1593_vm9 = vcmp.eq.f32.partialorder %v3789_v62, inf  ;;  %v4047_v48 = vadd.f32 %v2130_v24, %v3658_v8  ;;  %v1596_v4 = vand.u32 2147483648, %v3789_v62 }
 0x51b   : > { %v2219_v42 = vmul.f32 0.15915494, %v2215_v22  ;;  %v4039_v29 = vsel %vm1662_vm2, %v2241_v63, %v2253_v32  ;;  %v2050_v35 = vadd.s32 536870912, %v2049_v19  ;;  %v1594_v15 = vsel %vm1593_vm9, %v3789_v62, %v1592_v13 }
 0x51c   : > { %v2265_v17 = vand.u32 2147483647, %v4039_v29  ;;  %v2268_v37 = vand.u32 2139095040, %v4039_v29  ;;  %vm1595_vm10 = vcmp.eq.f32.partialorder %v3789_v62, 0.0  ;;  %v1875_v57 = vand.u32 3, %v1874_v28 }
 0x51d   : > { %v2223_v5 = vfloor.f32 %v2219_v42  ;;  %v4050_v21 = vshrl.u32 %v2050_v35, 30  ;;  %vm4060_vm11 = vcmp.lt.s32.totalorder %v2145_v20, 512  ;;  %v4066_v23 = vmul.f32 0.1, %v4047_v48 }
 0x51e   : > { %v2269_v11 = vshrl.u32 %v2268_v37, 23  ;;  %v2272_v44 = vand.u32 8388607, %v2265_v17  ;;  %v4068_v62 = vsel %vm1595_vm10, %v1596_v4, %v1594_v15  ;;  %2916 = vst.msk [vmem:[%s3692_s17 + $0x7] ss:$8 sm:$0xf] %vm4060_vm11, %v3269_v36  ;;  %vm1873_vm0 = vweird.f32 %v3758_v12 }
 0x51f   : > { %v2227_v52 = vmul.f32 6.2831855, %v2223_v5  ;;  %v2052_v47 = vshll.u32 %v4050_v21, 30  ;;  %vm1877_vm13 = vcmp.eq.s32.totalorder %v1875_v57, 0  ;;  %vm1880_vm14 = vcmp.eq.s32.totalorder %v1875_v57, 2 }
 0x520   : > { %v2899_v31 = vadd.s32 4294967169, %v2269_v11  ;;  %v2273_v6 = vor.u32 8388608, %v2272_v44  ;;  %vm1876_vm15 = vcmp.lt.s32.totalorder %v1875_v57, 2  ;;  %v2152_v22 = vrot.slane %v4066_v23, %v3803_v50 }
 0x521   : > { %v4056_v43 = vsub.f32 %v2211_v41, %v2227_v52  ;;  %v4074_v20 = vsub.s32 %v2049_v19, %v2052_v47  ;;  %v2096_v36 = vmul.f32 0.05, %v4068_v62  ;;  %v2692_v16 = vrot.slane %v4047_v48, %v3803_v50 }
 0x522   : > { %v2275_v0 = vadd.s32 1, %v2899_v31  ;;  %v2313_v32 = vshll.u32 %v2273_v6, 8 }
 0x523   : > { %v3178_v8 = vpop.eup %3177  ;;  %v2235_v59 = vadd.f32 1.5707964, %v4056_v43  ;;  %v2255_v3 = vrot.slane %v4056_v43, 3  ;;  %v2055_v27 = vsub.s32 0, %v4074_v20 }
 0x524   : > { %v3180_v45 = vpop.eup %3179  ;;  %v1881_v56 = vxor.u32 2147483648, %v3178_v8  ;;  %vm2276_vm12 = vcmp.gt.s32.totalorder %v2275_v0, 0 }
 0x525   : > { %v1878_v41 = vxor.u32 2147483648, %v3180_v45  ;;  %v2277_v25 = vsel %vm2276_vm12, %v2275_v0, 0  ;;  %v2243_v54 = vrot.slane %v2235_v59, 4 }
 0x526   : > { %v2279_v61 = vand.u32 31, %v2277_v25  ;;  %v1882_v60 = vsel %vm1880_vm14, %v1881_v56, %v3180_v45  ;;  %v2278_v18 = vshrl.u32 %v2277_v25, 5 }
 0x527   : > { %v1879_v30 = vsel %vm1877_vm13, %v3178_v8, %v1878_v41  ;;  %v4084_v19 = vsel %vm1662_vm2, %v2243_v54, %v2255_v3 }
 0x528   : > { %v2280_v63 = vsub.s32 32, %v2279_v61  ;;  %v2282_v42 = vshll.u32 %v3271_v49, %v2279_v61  ;;  %v2285_v34 = vshll.u32 %v3272_v51, %v2279_v61  ;;  %v1883_v24 = vsel %vm1876_vm15, %v1879_v30, %v1882_v60 }
 0x529   : > { %v2288_v5 = vshll.u32 %v3273_v53, %v2279_v61  ;;  %v2291_v35 = vshll.u32 %v3274_v55, %v2279_v61  ;;  %v2294_v52 = vshll.u32 %v3275_v58, %v2279_v61  ;;  %vm2297_vm1 = vcmp.lt.s32.totalorder %v2278_v18, 1 }
 0x52a   : > { %v2283_v37 = vshrl.u32 %v3272_v51, %v2280_v63  ;;  %v2286_v13 = vshrl.u32 %v3273_v53, %v2280_v63  ;;  %v2289_v28 = vshrl.u32 %v3274_v55, %v2280_v63  ;;  %v2292_v11 = vshrl.u32 %v3275_v58, %v2280_v63 }
 0x52b   : > { %v2295_v4 = vshrl.u32 %v3276_v9, %v2280_v63  ;;  %vm2300_vm3 = vcmp.lt.s32.totalorder %v2278_v18, 4  ;;  %v2476_v8 = vand.u32 2139095040, %v4084_v19  ;;  %vm2298_vm4 = vcmp.lt.s32.totalorder %v2278_v18, 2 }
 0x52c   : > { %v2284_v31 = vor.u32 %v2283_v37, %v2282_v42  ;;  %v2287_v44 = vor.u32 %v2286_v13, %v2285_v34  ;;  %v2290_v15 = vor.u32 %v2289_v28, %v2288_v5  ;;  %v2293_v57 = vor.u32 %v2292_v11, %v2291_v35 }
 0x52d   : > { %v2296_v47 = vor.u32 %v2295_v4, %v2294_v52  ;;  %v2281_v56 = vshrl.u32 %v3271_v49, %v2280_v63  ;;  %vm2299_vm5 = vcmp.lt.s32.totalorder %v2278_v18, 3  ;;  %v2473_v54 = vand.u32 2147483647, %v4084_v19 }
 0x52e   : > { %v2302_v0 = vsel %vm2300_vm3, %v2290_v15, 2102212464  ;;  %v2305_v45 = vsel %vm2297_vm1, %v2284_v31, %v2287_v44  ;;  %v2309_v59 = vsel %vm2297_vm1, %v2287_v44, %v2290_v15  ;;  %v2306_v23 = vsel %vm2300_vm3, %v2293_v57, 920167782 }
 0x52f   : > { %v2310_v6 = vsel %vm2300_vm3, %v2296_v47, 1326507024  ;;  %v2307_v41 = vsel %vm2299_vm5, %v2290_v15, %v2306_v23  ;;  %v2477_v61 = vshrl.u32 %v2476_v8, 23  ;;  %v2301_v30 = vsel %vm2297_vm1, %v2281_v56, %v2284_v31 }
 0x530   : > { %v2311_v25 = vsel %vm2299_vm5, %v2293_v57, %v2310_v6  ;;  %v2303_v60 = vsel %vm2299_vm5, %v2287_v44, %v2302_v0  ;;  %v2308_v3 = vsel %vm2298_vm4, %v2305_v45, %v2307_v41  ;;  %v1884_v28 = vsel %vm1873_vm0, nan, %v1883_v24 }
 0x531   : > { %v2312_v42 = vsel %vm2298_vm4, %v2309_v59, %v2311_v25  ;;  %v4106_v13 = vmul.u32.u64.low %v2313_v32, %v2308_v3  ;;  %v4107_v63 = vmul.u32.u64.high %v2313_v32, %v2308_v3, %v4106_v13  ;;  %v2907_v5 = vadd.s32 4294967169, %v2477_v61 }
 0x532   : > { %v4103_v34 = vmul.u32.u64.low %v2313_v32, %v2312_v42  ;;  %v4104_v37 = vmul.u32.u64.high %v2313_v32, %v2312_v42, %v4103_v34  ;;  %v2896_v35 = vmin.u32 %v2055_v27, %v4074_v20  ;;  %v2304_v11 = vsel %vm2298_vm4, %v2301_v30, %v2303_v60 }
 0x533   : > { %v2162_v52 = vmul.f32 %v2152_v22, %v1884_v28  ;;  %v2483_v4 = vadd.s32 1, %v2907_v5  ;;  %v2100_v31 = vadd.f32 0.01, %v2096_v36  ;;  %v2323_v44 = vadd.s32 1, %v4107_v63 }
 0x534   : > { %vm2322_vm6 = vc.u32 %v4104_v37, %v4106_v13  ;;  %v2480_v15 = vand.u32 8388607, %v2473_v54  ;;  %v2320_v12 = vmul.u32 %v2313_v32, %v2304_v11  ;;  %v2057_v24 = vclz %v2896_v35 }
 0x535   : > { %v2166_v57 = vadd.f32 %v2162_v52, %v3451_v2  ;;  %vm2484_vm7 = vcmp.gt.s32.totalorder %v2483_v4, 0  ;;  %v2324_v27 = vsel %vm2322_vm6, %v2323_v44, %v4107_v63  ;;  %3181 = vrcp.f32 %v1884_v28 }
 0x536   : > { %v2485_v18 = vsel %vm2484_vm7, %v2483_v4, 0  ;;  %v2325_v22 = vadd.s32 %v2324_v27, %v2320_v12  ;;  %v2481_v36 = vor.u32 8388608, %v2480_v15  ;;  %v2170_v8 = vmul.f32 0.033783782, %v4047_v48 }
 0x537   : > { %2682 = vst [vmem:[%s3692_s17 + $0x8] sm:$0x3] %v2166_v57  ;;  %v2487_v47 = vand.u32 31, %v2485_v18  ;;  %v4124_v0 = vmul.f32 %v2100_v31, %v4068_v62  ;;  %v2178_v56 = vrot.slane %v1884_v28, 1  ;;  %v2897_v23 = vadd.s32 4294967294, %v2057_v24 }
 0x538   : > { %v2326_v45 = vadd.s32 536870912, %v2325_v22  ;;  %v2486_v32 = vshrl.u32 %v2485_v18, 5  ;;  %v2521_v52 = vshll.u32 %v2481_v36, 8  ;;  %vm2267_vm0 = vcmp.lt.s32.totalorder %v4039_v29, 0 }
 0x539   : > { %v2488_v59 = vsub.s32 32, %v2487_v47  ;;  %v2490_v6 = vshll.u32 %v3271_v49, %v2487_v47  ;;  %v2493_v41 = vshll.u32 %v3272_v51, %v2487_v47  ;;  %v2496_v25 = vshll.u32 %v3273_v53, %v2487_v47 }
 0x53a   : > { %v4129_v61 = vshrl.u32 %v2326_v45, 30  ;;  %v2499_v3 = vshll.u32 %v3274_v55, %v2487_v47  ;;  %v2502_v63 = vshll.u32 %v3275_v58, %v2487_v47  ;;  %v2186_v15 = vmul.f32 %v2178_v56, %v2170_v8 }
 0x53b   : > { %v2491_v30 = vshrl.u32 %v3272_v51, %v2488_v59  ;;  %v2494_v60 = vshrl.u32 %v3273_v53, %v2488_v59  ;;  %v2497_v42 = vshrl.u32 %v3274_v55, %v2488_v59  ;;  %v2500_v34 = vshrl.u32 %v3275_v58, %v2488_v59 }
 0x53c   : > { %v2503_v5 = vshrl.u32 %v3276_v9, %v2488_v59  ;;  %v2328_v28 = vshll.u32 %v4129_v61, 30  ;;  %vm2505_vm8 = vcmp.lt.s32.totalorder %v2486_v32, 1  ;;  %vm2508_vm9 = vcmp.lt.s32.totalorder %v2486_v32, 4 }
 0x53d   : > { %v2492_v35 = vor.u32 %v2491_v30, %v2490_v6  ;;  %v2495_v11 = vor.u32 %v2494_v60, %v2493_v41  ;;  %v2498_v4 = vor.u32 %v2497_v42, %v2496_v25  ;;  %v2501_v31 = vor.u32 %v2500_v34, %v2499_v3 }
 0x53e   : > { %v2504_v44 = vor.u32 %v2503_v5, %v2502_v63  ;;  %v2329_v57 = vsub.s32 %v2325_v22, %v2328_v28  ;;  %vm2898_vm10 = vcmp.lt.s32.totalorder %v2897_v23, 0  ;;  %vm2507_vm12 = vcmp.lt.s32.totalorder %v2486_v32, 3 }
 0x53f   : > { %v2510_v12 = vsel %vm2508_vm9, %v2498_v4, 2102212464  ;;  %v2513_v24 = vsel %vm2505_vm8, %v2492_v35, %v2495_v11  ;;  %v2514_v27 = vsel %vm2508_vm9, %v2501_v31, 920167782  ;;  %v3182_v18 = vpop.eup %3181  ;;  %v2489_v45 = vshrl.u32 %v3271_v49, %v2488_v59 }
 0x540   : > { %v2331_v47 = vsub.s32 0, %v2329_v57  ;;  %vm2506_vm13 = vcmp.lt.s32.totalorder %v2486_v32, 2  ;;  %v2515_v36 = vsel %vm2507_vm12, %v2498_v4, %v2514_v27  ;;  %v2517_v8 = vsel %vm2505_vm8, %v2495_v11, %v2498_v4 }
 0x541   : > { %v2516_v6 = vsel %vm2506_vm13, %v2513_v24, %v2515_v36  ;;  %v2518_v22 = vsel %vm2508_vm9, %v2504_v44, 1326507024  ;;  %v2060_v56 = vsel %vm2898_vm10, 0, %v2897_v23  ;;  %v2509_v25 = vsel %vm2505_vm8, %v2489_v45, %v2492_v35 }
 0x542   : > { %v2900_v41 = vmin.u32 %v2331_v47, %v2329_v57  ;;  %v2511_v30 = vsel %vm2507_vm12, %v2495_v11, %v2510_v12  ;;  %v2519_v60 = vsel %vm2507_vm12, %v2501_v31, %v2518_v22  ;;  %v2194_v34 = vmul.f32 %v3182_v18, %v2186_v15 }
 0x543   : > { %v2520_v3 = vsel %vm2506_vm13, %v2517_v8, %v2519_v60  ;;  %v4148_v42 = vmul.u32.u64.low %v2521_v52, %v2516_v6  ;;  %v4149_v59 = vmul.u32.u64.high %v2521_v52, %v2516_v6, %v4148_v42  ;;  %v2512_v44 = vsel %vm2506_vm13, %v2509_v25, %v2511_v30 }
 0x544   : > { %v2333_v63 = vclz %v2900_v41  ;;  %v4152_v5 = vmul.u32.u64.low %v2521_v52, %v2520_v3  ;;  %v4153_v28 = vmul.u32.u64.high %v2521_v52, %v2520_v3, %v4152_v5  ;;  %v2202_v4 = vrot.slane %v2194_v34, 6 }
 0x545   : > { %v2061_v35 = vsub.s32 32, %v2060_v56  ;;  %v2065_v24 = vsub.s32 4294967266, %v2060_v56  ;;  %v2531_v11 = vadd.s32 1, %v4149_v59  ;;  %v2112_v12 = vrot.slane %v4124_v0, 2 }
 0x546   : > { %v2901_v23 = vadd.s32 4294967294, %v2333_v63  ;;  %v2210_v31 = vadd.f32 %v2202_v4, %v3451_v2  ;;  %v2321_v27 = vadd.s32 %v4106_v13, %v4104_v37  ;;  %v2045_v15 = vadd.s32 %v3999_v46, %v4010_v33 }
 0x547   : > { %v2066_v18 = vadd.s32 127, %v2065_v24  ;;  %v2528_v45 = vmul.u32 %v2521_v52, %v2512_v44  ;;  %vm2530_vm15 = vc.u32 %v4153_v28, %v4148_v42  ;;  %v2120_v37 = vsub.f32 %v3614_v38, %v2112_v12 }
 0x548   : > { %vm2902_vm14 = vcmp.lt.s32.totalorder %v2901_v23, 0  ;;  %v2214_v32 = vadd.f32 3.1415927, %v2210_v31  ;;  %v2532_v2 = vsel %vm2530_vm15, %v2531_v11, %v4149_v59  ;;  %v2063_v8 = vshrl.u32 %v2045_v15, %v2061_v35 }
 0x549   : > { %v2336_v47 = vsel %vm2902_vm14, 0, %v2901_v23  ;;  %v2533_v0 = vadd.s32 %v2532_v2, %v2528_v45  ;;  %v2067_v41 = vshll.u32 %v2066_v18, 23  ;;  %v2062_v33 = vshll.u32 %v4074_v20, %v2060_v56 }
 0x54a   : > { %v2337_v36 = vsub.s32 32, %v2336_v47  ;;  %v2341_v6 = vsub.s32 4294967266, %v2336_v47  ;;  %v2218_v22 = vmul.f32 0.15915494, %v2214_v32  ;;  %v2338_v13 = vshll.u32 %v2329_v57, %v2336_v47 }
 0x54b   : > { %v2534_v52 = vadd.s32 536870912, %v2533_v0  ;;  %v2068_v60 = vor.u32 4788187, %v2067_v41  ;;  %v2351_v63 = vsub.s32 4, %v4129_v61  ;;  %v2064_v5 = vor.u32 %v2063_v8, %v2062_v33 }
 0x54c   : > { %v2339_v25 = vshrl.u32 %v2321_v27, %v2337_v36  ;;  %v2342_v46 = vadd.s32 127, %v2341_v6  ;;  %v2222_v30 = vfloor.f32 %v2218_v22  ;;  %v2124_v23 = vmul.f32 0.1, %v2120_v37 }
 0x54d   : > { %v2535_v59 = vshrl.u32 %v2534_v52, 30  ;;  %v2069_v35 = vand.u32 2147483647, %v2068_v60  ;;  %v2075_v20 = vsub.s32 4, %v4050_v21  ;;  %v2352_v11 = vsel %vm2267_vm0, %v2351_v63, %v4129_v61 }
 0x54e   : > { %v2340_v3 = vor.u32 %v2339_v25, %v2338_v13  ;;  %v2343_v34 = vshll.u32 %v2342_v46, 23  ;;  %v2226_v4 = vmul.f32 6.2831855, %v2222_v30  ;;  %v2071_v12 = vcvt.s32.f32 %v2064_v5 }
 0x54f   : > { %v2536_v38 = vshll.u32 %v2535_v59, 30  ;;  %vm1991_vm1 = vcmp.lt.s32.totalorder %v3917_v26, 0  ;;  %v2132_v18 = vrot.slane %v2124_v23, 6  ;;  %vm4180_vm3 = vcmp.le.f32.partialorder %v2265_v17, 0.7853982 }
 0x550   : > { %v2344_v44 = vor.u32 4788187, %v2343_v34  ;;  %v4170_v57 = vsub.f32 %v2210_v31, %v2226_v4  ;;  %v2347_v24 = vcvt.s32.f32 %v2340_v3  ;;  %v2072_v32 = vmul.f32 %v2071_v12, %v2069_v35 }
 0x551   : > { %v2537_v27 = vsub.s32 %v2533_v0, %v2536_v38  ;;  %v2354_v61 = vsel %vm4180_vm3, 0, %v2352_v11  ;;  %v2076_v17 = vsel %vm1991_vm1, %v2075_v20, %v4050_v21  ;;  %vm4197_vm4 = vcmp.le.f32.partialorder %v1989_v7, 0.7853982 }
 0x552   : > { %v2345_v56 = vand.u32 2147483647, %v2344_v44  ;;  %v2234_v15 = vadd.f32 1.5707964, %v4170_v57  ;;  %v2721_v45 = vcombine.high %v4012_v10, %v4170_v57  ;;  %v2254_v2 = vrot.slane %v4170_v57, 3 }
 0x553   : > { %v2539_v36 = vsub.s32 0, %v2537_v27  ;;  %v2358_v13 = vadd.s32 3, %v2354_v61  ;;  %v2073_v46 = vxor.u32 2147483648, %v2072_v32  ;;  %v2078_v52 = vsel %vm4197_vm4, 0, %v2076_v17 }
 0x554   : > { %v2348_v47 = vmul.f32 %v2347_v24, %v2345_v56  ;;  %v2242_v6 = vrot.slane %v2234_v15, 4  ;;  %v4210_v7 = vadd.f32 %v2132_v18, %v4068_v62  ;;  %v2559_v30 = vsub.s32 4, %v2535_v59 }
 0x555   : > { %v2908_v0 = vmin.u32 %v2539_v36, %v2537_v27  ;;  %v2688_v3 = vrot.slane %v3904_v14, %v3803_v50  ;;  %v2359_v5 = vand.u32 3, %v2358_v13  ;;  %v2074_v23 = vsel %vm1991_vm1, %v2073_v46, %v2072_v32 }
 0x556   : > { %v2349_v8 = vxor.u32 2147483648, %v2348_v47  ;;  %v4193_v22 = vsel %vm1662_vm2, %v2242_v6, %v2254_v2  ;;  %v2082_v44 = vadd.s32 3, %v2078_v52  ;;  %vm4219_vm5 = vcmp.le.f32.partialorder %v2473_v54, 0.7853982 }
 0x557   : > { %v2372_v25 = vand.u32 2139095040, %v4193_v22  ;;  %v2541_v33 = vclz %v2908_v0  ;;  %v2369_v63 = vand.u32 2147483647, %v4193_v22  ;;  %vm2475_vm6 = vcmp.lt.s32.totalorder %v4084_v19, 0 }
 0x558   : > { %v2350_v37 = vsel %vm2267_vm0, %v2349_v8, %v2348_v47  ;;  %v4225_v35 = vmul.f32 0.1, %v4210_v7  ;;  %v2529_v38 = vadd.s32 %v4148_v42, %v4153_v28  ;;  %v4231_v56 = vsel %vm2475_vm6, %v2559_v30, %v2535_v59 }
 0x559   : > { %v2353_v21 = vsel %vm4180_vm3, %v4039_v29, %v2350_v37  ;;  %v2373_v60 = vshrl.u32 %v2372_v25, 23  ;;  %v2909_v34 = vadd.s32 4294967294, %v2541_v33  ;;  %v2376_v12 = vand.u32 8388607, %v2369_v63 }
 0x55a   : > { %3183 = vcosq.f32 %v2353_v21  ;;  %v2077_v15 = vsel %vm4197_vm4, %v3917_v26, %v2074_v23  ;;  %vm2360_vm8 = vcmp.lt.s32.totalorder %v2359_v5, 2  ;;  %vm2361_vm9 = vcmp.eq.s32.totalorder %v2359_v5, 0 }
 0x55b   : > { %3185 = vsinq.f32 %v2353_v21  ;;  %v2903_v4 = vadd.s32 4294967169, %v2373_v60  ;;  %vm2910_vm7 = vcmp.lt.s32.totalorder %v2909_v34, 0  ;;  %v4238_v18 = vand.u32 3, %v2082_v44 }
 0x55c   : > { %v2544_v20 = vsel %vm2910_vm7, 0, %v2909_v34  ;;  %vm2357_vm12 = vweird.f32 %v4039_v29  ;;  %vm2364_vm13 = vcmp.eq.s32.totalorder %v2359_v5, 2  ;;  %v2562_v47 = vsel %vm4219_vm5, 0, %v4231_v56 }
 0x55d   : > { %v2379_v24 = vadd.s32 1, %v2903_v4  ;;  %v2545_v11 = vsub.s32 32, %v2544_v20  ;;  %v2549_v54 = vsub.s32 4294967266, %v2544_v20  ;;  %v2546_v42 = vshll.u32 %v2537_v27, %v2544_v20 }
 0x55e   : > { %3187 = vcosq.f32 %v2077_v15  ;;  %v2377_v6 = vor.u32 8388608, %v2376_v12  ;;  %vm2084_vm3 = vcmp.lt.s32.totalorder %v4238_v18, 2  ;;  %vm2085_vm4 = vcmp.eq.s32.totalorder %v4238_v18, 0 }
 0x55f   : > { %vm2380_vm10 = vcmp.gt.s32.totalorder %v2379_v24, 0  ;;  %v2547_v28 = vshrl.u32 %v2529_v38, %v2545_v11  ;;  %v2550_v59 = vadd.s32 127, %v2549_v54  ;;  %3189 = vsinq.f32 %v2077_v15 }
 0x560   : > { %v2381_v31 = vsel %vm2380_vm10, %v2379_v24, 0  ;;  %v2417_v24 = vshll.u32 %v2377_v6, 8  ;;  %vm2081_vm7 = vweird.f32 %v3917_v26 }
 0x561   : > { %v2383_v32 = vand.u32 31, %v2381_v31  ;;  %v2548_v61 = vor.u32 %v2547_v28, %v2546_v42  ;;  %v2551_v36 = vshll.u32 %v2550_v59, 23  ;;  %v4244_v8 = vshrl.u32 %v2381_v31, 5 }
 0x563   : > { %v2384_v17 = vsub.s32 32, %v2383_v32  ;;  %v2386_v27 = vshll.u32 %v3271_v49, %v2383_v32  ;;  %v2389_v0 = vshll.u32 %v3272_v51, %v2383_v32  ;;  %v2552_v13 = vor.u32 4788187, %v2551_v36 }
 0x564   : > { %v3184_v2 = vpop.eup %3183  ;;  %v2555_v25 = vcvt.s32.f32 %v2548_v61  ;;  %v2392_v46 = vshll.u32 %v3273_v53, %v2383_v32  ;;  %v2395_v30 = vshll.u32 %v3274_v55, %v2383_v32  ;;  %v2398_v59 = vshll.u32 %v3275_v58, %v2383_v32 }
 0x565   : > { %v3186_v41 = vpop.eup %3185  ;;  %v2365_v37 = vxor.u32 2147483648, %v3184_v2  ;;  %v2387_v33 = vshrl.u32 %v3272_v51, %v2384_v17  ;;  %v2390_v52 = vshrl.u32 %v3273_v53, %v2384_v17  ;;  %v2553_v34 = vand.u32 2147483647, %v2552_v13 }
 0x566   : > { %v2362_v21 = vxor.u32 2147483648, %v3186_v41  ;;  %v2393_v4 = vshrl.u32 %v3274_v55, %v2384_v17  ;;  %v2396_v23 = vshrl.u32 %v3275_v58, %v2384_v17  ;;  %v2385_v28 = vshrl.u32 %v3271_v49, %v2384_v17 }
 0x567   : > { %v2366_v60 = vsel %vm2364_vm13, %v2365_v37, %v3186_v41  ;;  %v2388_v38 = vor.u32 %v2387_v33, %v2386_v27  ;;  %v2391_v20 = vor.u32 %v2390_v52, %v2389_v0  ;;  %v2556_v54 = vmul.f32 %v2555_v25, %v2553_v34 }
 0x568   : > { %v2363_v44 = vsel %vm2361_vm9, %v3184_v2, %v2362_v21  ;;  %v2394_v12 = vor.u32 %v2393_v4, %v2392_v46  ;;  %v2397_v15 = vor.u32 %v2396_v23, %v2395_v30  ;;  %v2399_v31 = vshrl.u32 %v3276_v9, %v2384_v17  ;;  %v3188_v5 = vpop.eup %3187 }
 0x569   : > { %v2367_v11 = vsel %vm2360_vm8, %v2363_v44, %v2366_v60  ;;  %v2557_v36 = vxor.u32 2147483648, %v2556_v54  ;;  %vm2401_vm14 = vcmp.lt.s32.totalorder %v4244_v8, 1  ;;  %vm2404_vm15 = vcmp.lt.s32.totalorder %v4244_v8, 4  ;;  %v3190_v2 = vpop.eup %3189 }
 0x56a   : > { %v2368_v42 = vsel %vm2357_vm12, nan, %v2367_v11  ;;  %v2400_v6 = vor.u32 %v2399_v31, %v2398_v59  ;;  %vm2402_vm0 = vcmp.lt.s32.totalorder %v4244_v8, 2  ;;  %v2406_v29 = vsel %vm2404_vm15, %v2394_v12, 2102212464 }
 0x56b   : > { %v2701_v61 = vmul.f32 %v2688_v3, %v2368_v42  ;;  %v2409_v32 = vsel %vm2401_vm14, %v2388_v38, %v2391_v20  ;;  %v2558_v14 = vsel %vm2475_vm6, %v2557_v36, %v2556_v54  ;;  %vm2403_vm1 = vcmp.lt.s32.totalorder %v4244_v8, 3 }
 0x56c   : > { %v2410_v3 = vsel %vm2404_vm15, %v2397_v15, 920167782  ;;  %v2561_v27 = vsel %vm4219_vm5, %v4084_v19, %v2558_v14  ;;  %v2405_v0 = vsel %vm2401_vm14, %v2385_v28, %v2388_v38  ;;  %v2413_v37 = vsel %vm2401_vm14, %v2391_v20, %v2394_v12 }
 0x56d   : > { %v2709_v17 = vrot.slane %v2701_v61, 6  ;;  %v2411_v41 = vsel %vm2403_vm1, %v2394_v12, %v2410_v3  ;;  %3191 = vcosq.f32 %v2561_v27  ;;  %v2407_v13 = vsel %vm2403_vm1, %v2391_v20, %v2406_v29 }
 0x56e   : > { %v2412_v25 = vsel %vm2402_vm0, %v2409_v32, %v2411_v41  ;;  %v2414_v46 = vsel %vm2404_vm15, %v2400_v6, 1326507024  ;;  %3193 = vsinq.f32 %v2561_v27  ;;  %v2086_v60 = vxor.u32 2147483648, %v3190_v2 }
 0x56f   : > { %2717 = vst [vmem:[%s3692_s17] sm:$0xc] %v2709_v17  ;;  %v2415_v21 = vsel %vm2403_vm1, %v2397_v15, %v2414_v46  ;;  %v4283_v33 = vmul.u32.u64.low %v2417_v24, %v2412_v25  ;;  %v4284_v52 = vmul.u32.u64.high %v2417_v24, %v2412_v25, %v4283_v33  ;;  %v2089_v34 = vxor.u32 2147483648, %v3188_v5 }
 0x570   : > { %v2416_v30 = vsel %vm2402_vm0, %v2413_v37, %v2415_v21  ;;  %vm2088_vm6 = vcmp.eq.s32.totalorder %v4238_v18, 2  ;;  %v2566_v44 = vadd.s32 3, %v2562_v47  ;;  %v2408_v38 = vsel %vm2402_vm0, %v2405_v0, %v2407_v13 }
 0x571   : > { %v4290_v4 = vmul.u32.u64.low %v2417_v24, %v2416_v30  ;;  %v4291_v23 = vmul.u32.u64.high %v2417_v24, %v2416_v30, %v4290_v4  ;;  %v2087_v20 = vsel %vm2085_vm4, %v3188_v5, %v2086_v60  ;;  %v2090_v11 = vsel %vm2088_vm6, %v2089_v34, %v3190_v2 }
 0x572   : > { %v2427_v54 = vadd.s32 1, %v4284_v52  ;;  %v2091_v12 = vsel %vm2084_vm3, %v2087_v20, %v2090_v11  ;;  %v2160_v15 = vrot.slane %v4225_v35, %v3803_v50  ;;  %v2424_v42 = vmul.u32 %v2417_v24, %v2408_v38 }
 0x573   : > { %v2092_v18 = vsel %vm2081_vm7, nan, %v2091_v12  ;;  %vm2426_vm5 = vc.u32 %v4291_v23, %v4283_v33  ;;  %v2567_v56 = vand.u32 3, %v2566_v44  ;;  %v2696_v29 = vrot.slane %v3921_v40, %v3803_v50 }
 0x574   : > { %v2164_v62 = vmul.f32 %v2160_v15, %v2092_v18  ;;  %v2428_v47 = vsel %vm2426_vm5, %v2427_v54, %v4284_v52  ;;  %3195 = vrcp.f32 %v2092_v18  ;;  %v2180_v5 = vrot.slane %v2092_v18, 1 }
 0x575   : > { %v2429_v8 = vadd.s32 %v2428_v47, %v2424_v42  ;;  %vm2572_vm8 = vcmp.eq.s32.totalorder %v2567_v56, 2  ;;  %vm2569_vm9 = vcmp.eq.s32.totalorder %v2567_v56, 0  ;;  %vm2568_vm10 = vcmp.lt.s32.totalorder %v2567_v56, 2 }
 0x576   : > { %v2168_v28 = vadd.f32 %v2164_v62, %v3449_v1  ;;  %vm2565_vm12 = vweird.f32 %v4084_v19  ;;  %v2172_v17 = vmul.f32 0.033783782, %v4210_v7  ;;  %v3277_v30 = vmov 1966171168  }
 0x577   : > { %v3192_v59 = vpop.eup %3191  ;;  %v2430_v61 = vadd.s32 536870912, %v2429_v8  ;;  %v2724_v40 = vunpack.c.l.s4 %v3277_v30  ;;  %v2425_v20 = vadd.s32 %v4283_v33, %v4291_v23  ;;  %vm2371_vm14 = vcmp.lt.s32.totalorder %v4193_v22, 0 }
 0x578   : > { %v3194_v26 = vpop.eup %3193  ;;  %v2573_v31 = vxor.u32 2147483648, %v3192_v59  ;;  %2684 = vst [vmem:[%s3692_s17 + $0x18] sm:$0x3] %v2168_v28  ;;  %v2188_v0 = vmul.f32 %v2180_v5, %v2172_v17  ;;  %vm2370_vm15 = vcmp.le.f32.partialorder %v2369_v63, 0.7853982  ;;  %vm2461_vm0 = vweird.f32 %v4193_v22 }
 0x579   : > { %v2570_v36 = vxor.u32 2147483648, %v3194_v26  ;;  %v2431_v24 = vshrl.u32 %v2430_v61, 30  ;;  %v2725_v44 = vunpack.c.0.s8 %v2724_v40 }
 0x57a   : > { %v2574_v35 = vsel %vm2572_vm8, %v2573_v31, %v3194_v26 }
 0x57b   : > { %v2571_v6 = vsel %vm2569_vm9, %v3192_v59, %v2570_v36  ;;  %v2432_v2 = vshll.u32 %v2431_v24, 30  ;;  %v2728_v62 = vsub.s32 %v2725_v44, %v3785_v39 }
 0x57c   : > { %v2575_v32 = vsel %vm2568_vm10, %v2571_v6, %v2574_v35 }
 0x57d   : > { %v2576_v14 = vsel %vm2565_vm12, nan, %v2575_v32  ;;  %v2433_v27 = vsub.s32 %v2429_v8, %v2432_v2  ;;  %v2455_v8 = vsub.s32 4, %v2431_v24  ;;  %v2729_v26 = vrot.slane %v2721_v45, %v2728_v62 }
 0x57e   : > { %v2703_v3 = vmul.f32 %v2696_v29, %v2576_v14  ;;  %v3196_v41 = vpop.eup %3195 }
 0x57f   : > { %v2435_v13 = vsub.s32 0, %v2433_v27  ;;  %v2196_v25 = vmul.f32 %v3196_v41, %v2188_v0  ;;  %v2456_v39 = vsel %vm2371_vm14, %v2455_v8, %v2431_v24 }
 0x580   : > { %v2711_v37 = vrot.slane %v2703_v3, 6  ;;  %v2458_v45 = vsel %vm2370_vm15, 0, %v2456_v39 }
 0x581   : > { %v2904_v46 = vmin.u32 %v2435_v13, %v2433_v27  ;;  %v2204_v21 = vrot.slane %v2196_v25, 6  ;;  %v2462_v3 = vadd.s32 3, %v2458_v45 }
 0x582   : > { %2719 = vst [vmem:[%s3692_s17 + $0x10] sm:$0xc] %v2711_v37 }
 0x583   : > { %v2437_v52 = vclz %v2904_v46  ;;  %v2212_v19 = vadd.f32 %v2204_v21, %v3449_v1  ;;  %v2463_v41 = vand.u32 3, %v2462_v3 }
 0x585   : > { %v2905_v60 = vadd.s32 4294967294, %v2437_v52  ;;  %v2216_v34 = vadd.f32 3.1415927, %v2212_v19  ;;  %vm2464_vm1 = vcmp.lt.s32.totalorder %v2463_v41, 2  ;;  %vm2465_vm3 = vcmp.eq.s32.totalorder %v2463_v41, 0 }
 0x587   : > { %vm2906_vm13 = vcmp.lt.s32.totalorder %v2905_v60, 0  ;;  %v2220_v38 = vmul.f32 0.15915494, %v2216_v34 }
 0x588   : > { %v2440_v4 = vsel %vm2906_vm13, 0, %v2905_v60 }
 0x589   : > { %v2441_v11 = vsub.s32 32, %v2440_v4  ;;  %v2445_v54 = vsub.s32 4294967266, %v2440_v4  ;;  %v2224_v12 = vfloor.f32 %v2220_v38  ;;  %v2442_v15 = vshll.u32 %v2433_v27, %v2440_v4 }
 0x58b   : > { %v2443_v18 = vshrl.u32 %v2425_v20, %v2441_v11  ;;  %v2446_v42 = vadd.s32 127, %v2445_v54  ;;  %v2228_v56 = vmul.f32 6.2831855, %v2224_v12 }
 0x58d   : > { %v2444_v47 = vor.u32 %v2443_v18, %v2442_v15  ;;  %v2447_v1 = vshll.u32 %v2446_v42, 23  ;;  %v2232_v28 = vsub.f32 %v2212_v19, %v2228_v56 }
 0x58f   : > { %v2448_v59 = vor.u32 4788187, %v2447_v1  ;;  %v2236_v31 = vadd.f32 1.5707964, %v2232_v28  ;;  %v2722_v33 = vcombine.high %v4056_v43, %v2232_v28  ;;  %v2451_v61 = vcvt.s32.f32 %v2444_v47 }
 0x590   : > { %v2256_v35 = vrot.slane %v2232_v28, 3 }
 0x591   : > { %v2449_v23 = vand.u32 2147483647, %v2448_v59  ;;  %v2244_v36 = vrot.slane %v2236_v31, 4  ;;  %v2736_v5 = vrot.slane %v2722_v33, %v2728_v62 }
 0x593   : > { %v2452_v6 = vmul.f32 %v2451_v61, %v2449_v23  ;;  %v4329_v10 = vsel %vm1662_vm2, %v2244_v36, %v2256_v35  ;;  %v2737_v57 = vcombine.low %v2729_v26, %v2736_v5 }
 0x594   : > { %v2577_v29 = vand.u32 2147483647, %v4329_v10  ;;  %v2580_v32 = vand.u32 2139095040, %v4329_v10  ;;  %vm2579_vm10 = vcmp.lt.s32.totalorder %v4329_v10, 0 }
 0x595   : > { %v2453_v43 = vxor.u32 2147483648, %v2452_v6  ;;  %v2744_v2 = vrot.slane %v2737_v57, %v2728_v62 }
 0x596   : > { %v2581_v17 = vshrl.u32 %v2580_v32, 23  ;;  %v2584_v27 = vand.u32 8388607, %v2577_v29  ;;  %vm2578_vm12 = vcmp.le.f32.partialorder %v2577_v29, 0.7853982 }
 0x597   : > { %v2454_v24 = vsel %vm2371_vm14, %v2453_v43, %v2452_v6  ;;  %2915 = vst.msk [vmem:[%s3692_s17 + $0x4] ss:$8 sm:$0xf] %vm4060_vm11, %v2744_v2  ;;  %vm2468_vm11 = vcmp.eq.s32.totalorder %v2463_v41, 2 }
 0x598   : > { %v2457_v14 = vsel %vm2370_vm15, %v4193_v22, %v2454_v24  ;;  %v2911_v63 = vadd.s32 4294967169, %v2581_v17  ;;  %v2585_v37 = vor.u32 8388608, %v2584_v27 }
 0x599   : > { %3197 = vcosq.f32 %v2457_v14 }
 0x59a   : > { %3199 = vsinq.f32 %v2457_v14  ;;  %v2587_v0 = vadd.s32 1, %v2911_v63  ;;  %v2625_v30 = vshll.u32 %v2585_v37, 8 }
 0x59c   : > { %vm2588_vm2 = vcmp.gt.s32.totalorder %v2587_v0, 0 }
 0x59d   : > { %v2589_v13 = vsel %vm2588_vm2, %v2587_v0, 0  ;;  %vm2669_vm2 = vweird.f32 %v4329_v10 }
 0x59e   : > { %v2590_v25 = vshrl.u32 %v2589_v13, 5  ;;  %v2591_v46 = vand.u32 31, %v2589_v13 }
 0x5a0   : > { %v2592_v21 = vsub.s32 32, %v2591_v46  ;;  %v2594_v52 = vshll.u32 %v3271_v49, %v2591_v46  ;;  %v2597_v40 = vshll.u32 %v3272_v51, %v2591_v46  ;;  %v2600_v19 = vshll.u32 %v3273_v53, %v2591_v46 }
 0x5a1   : > { %v2603_v60 = vshll.u32 %v3274_v55, %v2591_v46  ;;  %v2606_v34 = vshll.u32 %v3275_v58, %v2591_v46  ;;  %vm2609_vm4 = vcmp.lt.s32.totalorder %v2590_v25, 1  ;;  %vm2610_vm6 = vcmp.lt.s32.totalorder %v2590_v25, 2 }
 0x5a2   : > { %v2595_v44 = vshrl.u32 %v3272_v51, %v2592_v21  ;;  %v2598_v38 = vshrl.u32 %v3273_v53, %v2592_v21  ;;  %v2601_v48 = vshrl.u32 %v3274_v55, %v2592_v21  ;;  %v2604_v54 = vshrl.u32 %v3275_v58, %v2592_v21 }
 0x5a3   : > { %v3198_v4 = vpop.eup %3197  ;;  %v2607_v12 = vshrl.u32 %v3276_v9, %v2592_v21  ;;  %vm2612_vm7 = vcmp.lt.s32.totalorder %v2590_v25, 4  ;;  %v2593_v55 = vshrl.u32 %v3271_v49, %v2592_v21  ;;  %vm2611_vm5 = vcmp.lt.s32.totalorder %v2590_v25, 3 }
 0x5a4   : > { %v3200_v20 = vpop.eup %3199  ;;  %v2469_v11 = vxor.u32 2147483648, %v3198_v4  ;;  %v2596_v18 = vor.u32 %v2595_v44, %v2594_v52  ;;  %v2599_v42 = vor.u32 %v2598_v38, %v2597_v40  ;;  %v2602_v62 = vor.u32 %v2601_v48, %v2600_v19 }
 0x5a5   : > { %v2466_v15 = vxor.u32 2147483648, %v3200_v20  ;;  %v2605_v47 = vor.u32 %v2604_v54, %v2603_v60  ;;  %v2608_v51 = vor.u32 %v2607_v12, %v2606_v34 }
 0x5a6   : > { %v2470_v56 = vsel %vm2468_vm11, %v2469_v11, %v3200_v20  ;;  %v2614_v1 = vsel %vm2612_vm7, %v2602_v62, 2102212464  ;;  %v2617_v8 = vsel %vm2609_vm4, %v2596_v18, %v2599_v42  ;;  %v2621_v28 = vsel %vm2609_vm4, %v2599_v42, %v2602_v62 }
 0x5a7   : > { %v2467_v53 = vsel %vm2465_vm3, %v3198_v4, %v2466_v15  ;;  %v2618_v9 = vsel %vm2612_vm7, %v2605_v47, 920167782  ;;  %v2613_v26 = vsel %vm2609_vm4, %v2593_v55, %v2596_v18  ;;  %v2622_v33 = vsel %vm2612_vm7, %v2608_v51, 1326507024 }
 0x5a8   : > { %v2471_v58 = vsel %vm2464_vm1, %v2467_v53, %v2470_v56  ;;  %v2619_v31 = vsel %vm2611_vm5, %v2602_v62, %v2618_v9  ;;  %v2615_v61 = vsel %vm2611_vm5, %v2599_v42, %v2614_v1  ;;  %v2623_v39 = vsel %vm2611_vm5, %v2605_v47, %v2622_v33 }
 0x5a9   : > { %v2472_v59 = vsel %vm2461_vm0, nan, %v2471_v58  ;;  %v2620_v49 = vsel %vm2610_vm6, %v2617_v8, %v2619_v31  ;;  %v2624_v36 = vsel %vm2610_vm6, %v2621_v28, %v2623_v39  ;;  %v2616_v22 = vsel %vm2610_vm6, %v2613_v26, %v2615_v61 }
 0x5aa   : > { %v2702_v23 = vmul.f32 %v2692_v16, %v2472_v59  ;;  %v4365_v35 = vmul.u32.u64.low %v2625_v30, %v2620_v49  ;;  %v4366_v5 = vmul.u32.u64.high %v2625_v30, %v2620_v49, %v4365_v35  ;;  %v2632_v32 = vmul.u32 %v2625_v30, %v2616_v22 }
 0x5ab   : > { %v4368_v57 = vmul.u32.u64.low %v2625_v30, %v2624_v36  ;;  %v4369_v43 = vmul.u32.u64.high %v2625_v30, %v2624_v36, %v4368_v57  ;;  %v2700_v55 = vrot.slane %v4210_v7, %v3803_v50 }
 0x5ac   : > { %v2710_v6 = vrot.slane %v2702_v23, 6  ;;  %v2635_v45 = vadd.s32 1, %v4366_v5 }
 0x5ad   : > { %vm2634_vm8 = vc.u32 %v4369_v43, %v4365_v35  ;;  %v2633_v25 = vadd.s32 %v4365_v35, %v4369_v43 }
 0x5ae   : > { %2718 = vst [vmem:[%s3692_s17 + $0x8] sm:$0xc] %v2710_v6  ;;  %v2636_v2 = vsel %vm2634_vm8, %v2635_v45, %v4366_v5 }
 0x5af   : > { %v2637_v24 = vadd.s32 %v2636_v2, %v2632_v32 }
 0x5b1   : > { %v2638_v17 = vadd.s32 536870912, %v2637_v24 }
 0x5b3   : > { %v2639_v14 = vshrl.u32 %v2638_v17, 30 }
 0x5b5   : > { %v2640_v3 = vshll.u32 %v2639_v14, 30  ;;  %v2663_v38 = vsub.s32 4, %v2639_v14 }
 0x5b7   : > { %v2641_v63 = vsub.s32 %v2637_v24, %v2640_v3  ;;  %v2664_v11 = vsel %vm2579_vm10, %v2663_v38, %v2639_v14 }
 0x5b8   : > { %v2666_v12 = vsel %vm2578_vm12, 0, %v2664_v11 }
 0x5b9   : > { %v2643_v27 = vsub.s32 0, %v2641_v63  ;;  %v2670_v15 = vadd.s32 3, %v2666_v12 }
 0x5bb   : > { %v2912_v0 = vmin.u32 %v2643_v27, %v2641_v63  ;;  %v2671_v18 = vand.u32 3, %v2670_v15 }
 0x5bd   : > { %v2645_v41 = vclz %v2912_v0  ;;  %vm2676_vm13 = vcmp.eq.s32.totalorder %v2671_v18, 2  ;;  %vm2673_vm14 = vcmp.eq.s32.totalorder %v2671_v18, 0  ;;  %vm2672_vm15 = vcmp.lt.s32.totalorder %v2671_v18, 2 }
 0x5bf   : > { %v2913_v37 = vadd.s32 4294967294, %v2645_v41 }
 0x5c1   : > { %vm2914_vm9 = vcmp.lt.s32.totalorder %v2913_v37, 0 }
 0x5c2   : > { %v2648_v13 = vsel %vm2914_vm9, 0, %v2913_v37 }
 0x5c3   : > { %v2649_v46 = vsub.s32 32, %v2648_v13  ;;  %v2653_v16 = vsub.s32 4294967266, %v2648_v13  ;;  %v2650_v21 = vshll.u32 %v2641_v63, %v2648_v13 }
 0x5c5   : > { %v2651_v52 = vshrl.u32 %v2633_v25, %v2649_v46  ;;  %v2654_v30 = vadd.s32 127, %v2653_v16 }
 0x5c7   : > { %v2652_v40 = vor.u32 %v2651_v52, %v2650_v21  ;;  %v2655_v19 = vshll.u32 %v2654_v30, 23 }
 0x5c9   : > { %v2656_v60 = vor.u32 4788187, %v2655_v19  ;;  %v2659_v4 = vcvt.s32.f32 %v2652_v40 }
 0x5cb   : > { %v2657_v34 = vand.u32 2147483647, %v2656_v60 }
 0x5cd   : > { %v2660_v44 = vmul.f32 %v2659_v4, %v2657_v34 }
 0x5cf   : > { %v2661_v48 = vxor.u32 2147483648, %v2660_v44 }
 0x5d1   : > { %v2662_v20 = vsel %vm2579_vm10, %v2661_v48, %v2660_v44 }
 0x5d2   : > { %v2665_v54 = vsel %vm2578_vm12, %v4329_v10, %v2662_v20 }
 0x5d3   : > { %3201 = vcosq.f32 %v2665_v54 }
 0x5d4   : > { %3203 = vsinq.f32 %v2665_v54 }
 0x5dd   : > { %v3202_v42 = vpop.eup %3201 }
 0x5de   : > { %v3204_v62 = vpop.eup %3203  ;;  %v2677_v56 = vxor.u32 2147483648, %v3202_v42 }
 0x5df   : > { %v2674_v47 = vxor.u32 2147483648, %v3204_v62 }
 0x5e0   : > { %v2678_v29 = vsel %vm2676_vm13, %v2677_v56, %v3204_v62 }
 0x5e1   : > { %v2675_v51 = vsel %vm2673_vm14, %v3202_v42, %v2674_v47 }
 0x5e2   : > { %v2679_v53 = vsel %vm2672_vm15, %v2675_v51, %v2678_v29 }
 0x5e3   : > { %v2680_v1 = vsel %vm2669_vm2, nan, %v2679_v53 }
 0x5e4   : > { %v2704_v8 = vmul.f32 %v2700_v55, %v2680_v1 }
 0x5e6   : > { %v2712_v58 = vrot.slane %v2704_v8, 6 }
 0x5e8   : > { %2720 = vst [vmem:[%s3692_s17 + $0x18] sm:$0xc] %v2712_v58 }
 0x5e9   : > { %3218 = shalt.err (!%p3215_p3)
}
 0x5ea   : > { %s3219_s14 = scalar_lea.hbm %s4389_s25, 512  ;;  %s3223_s21 = scalar_lea.hbm %s4443_s9, 1024 }
 0x5eb   : > { %p3220_p4 = scmp.ne.s32.totalorder %s4389_s25, %s3219_s14  ;;  %p3224_p9 = scmp.lt.u32.totalorder %s4389_s25, %s4443_s9 }
 0x5ec   : > { %p3225_p10 = scmp.lt.u32.totalorder %s3223_s21, %s3219_s14  ;;  %p3227_p12 = scmp.lt.u32.totalorder %s3219_s14, %s4389_s25 }
 0x5ed   : > { %p3221_p7 = pnand %p3220_p4, %p3367_p5 }
 0x5ee   : > { %p3226_p11 = por %p3225_p10, %p3224_p9 }
 0x5ef   : > { %p3222_p8 = pneg %p3221_p7 }
 0x5f0   : > { %p3228_p13 = por %p3227_p12, %p3226_p11 }
 0x5f2   : > { %p3229_p0 = pnand %p3228_p13, %p3222_p8 }
 0x5f4   : > { %3232 = shalt.err (!%p3229_p0)
}
 0x5f5   : > { %3003 = dma.vmem_to_hbm [thread:$0]  (%p3367_p5), %s4391_s22, 512, %s4389_s25, %s2773_s26  }
 0x5f6 PF: > { %p3009_p1 = scmp.ge.s32.totalorder %s3267_s12, 2  ;;  %s2799_s27 = sand.u32 1, %s3255_s30  }
 0x5f7   : > { %s2800_s13 = scalar_lea.sflag [#allocation3], %s2799_s27 }
 0x5f8   : > { %p3006_p2 = pnand %p3009_p1, %p3371_p6 }
 0x5fa   : > { %3250 = dma.done.wait (!%p3006_p2), %s2800_s13, 512  }
 0x5fb   : > { %3252 = vsyncadd (!%p3006_p2), %s2800_s13, 4294966784  ;;  %p19_p3 = scmp.ge.s32.totalorder %s3354_s15, 4   ;;  %s4460_s30 = smov %s3259_s10 }
 0x5fc   : > { %s4461_s10 = smov %s3263_s11  ;;  %s4462_s11 = smov %s3365_s18 }
 0x5fd   : > { %s4463_s12 = smov %s3354_s15  ;;  %21 = sbr.rel (!%p19_p3) target bundleno = 3 (0x3), region = 93 }
 0x604   :  { %2805 = vsyncpa [#allocation3], 1 }
 0x605   :  { %2807 = vsyncpa [#allocation3 + $0x1], 1 }

</bundles_post_ra>
